<compile_context>
chip_gen: v7x
topology: tpu7x:2x2x1
jax: 0.10.0
libtpu: 0.0.40
codegen_flags: <defaults>
</compile_context>

<pallas_src>
import math
from functools import partial

import jax
import jax.numpy as jnp
from jax.experimental import pallas as pl
from jax.experimental.pallas import tpu as pltpu

# ---------------- config (small, consistent with the module's forward) ----------------
VOCAB = 100
HIDDEN = 32
SEQ = 8
BATCH = 2
HEADS = 4
HEAD_DIM = HIDDEN // HEADS
LAYERS = 2
INTER = 64
NUM_LABELS = 3
LN_EPS = 1e-12
SCALE = 1.0 / math.sqrt(HEAD_DIM)


def _gelu(x):
    # TODO(synk): HF BioBERT uses exact erf GELU; tanh approximation used here (erf has no
    # guaranteed Mosaic lowering) -> ~1e-3-level numeric difference vs the PyTorch reference.
    return 0.5 * x * (1.0 + jnp.tanh(0.7978845608028654 * (x + 0.044715 * x * x * x)))


# --------------------------------- fused kernel ---------------------------------
def fused_forward_kernel(x_ref, mask_ref, eg_ref, eb_ref,
                         wqkv_ref, bqkv_ref, wo_ref, bo_ref,
                         ln1g_ref, ln1b_ref, w1_ref, b1_ref,
                         w2_ref, b2_ref, ln2g_ref, ln2b_ref,
                         loh_ref, z_ref, theta_ref):
    def layernorm(h, g, b):
        mu = jnp.mean(h, axis=-1, keepdims=True)
        var = jnp.mean(jnp.square(h - mu), axis=-1, keepdims=True)
        return (h - mu) * jax.lax.rsqrt(var + LN_EPS) * g + b

    x = x_ref[0]                      # (S, H)  this batch element's summed embeddings
    mrow = mask_ref[0]                # (1, S)  additive key mask (0 / -10000)
    h = layernorm(x, eg_ref[...], eb_ref[...])            # embedding LN, no zero residual

    for l in range(LAYERS):           # static unroll; weights statically indexed per layer
        # ---- fused QKV projection: one (S,H)@(H,3H) MXU pass instead of three (H,H) ----
        qkv = jnp.dot(h, wqkv_ref[l], preferred_element_type=jnp.float32) + bqkv_ref[l]
        wo_l = wo_ref[l]              # (H, H)

        # ---- multi-head attention; head outputs folded straight into W_o:
        #      concat_h(o_h) @ W_o == sum_h o_h @ W_o[h*D:(h+1)*D, :]  (no transposes) ----
        attn = jnp.zeros((SEQ, HIDDEN), jnp.float32)
        for hh in range(HEADS):
            q = qkv[:, hh * HEAD_DIM:(hh + 1) * HEAD_DIM]
            k = qkv[:, HIDDEN + hh * HEAD_DIM:HIDDEN + (hh + 1) * HEAD_DIM]
            v = qkv[:, 2 * HIDDEN + hh * HEAD_DIM:2 * HIDDEN + (hh + 1) * HEAD_DIM]
            s = jax.lax.dot_general(q, k, (((1,), (1,)), ((), ())),
                                    preferred_element_type=jnp.float32) * SCALE + mrow
            s = s - jnp.max(s, axis=-1, keepdims=True)
            p = jnp.exp(s)
            p = p * pl.reciprocal(jnp.sum(p, axis=-1, keepdims=True), approx=True)
            o = jnp.dot(p, v, preferred_element_type=jnp.float32)            # (S, D)
            attn = attn + jnp.dot(o, wo_l[hh * HEAD_DIM:(hh + 1) * HEAD_DIM, :],
                                  preferred_element_type=jnp.float32)
        attn = attn + bo_ref[l]
        h = layernorm(attn + h, ln1g_ref[l], ln1b_ref[l])

        # ---- feed-forward ----
        ff = jnp.dot(h, w1_ref[l], preferred_element_type=jnp.float32) + b1_ref[l]
        ff = _gelu(ff)
        ff = jnp.dot(ff, w2_ref[l], preferred_element_type=jnp.float32) + b2_ref[l]
        h = layernorm(ff + h, ln2g_ref[l], ln2b_ref[l])

    # ---- DualCL heads, done on the VMEM-resident hidden states ----
    z_ref[0] = h[0:1, :]                                                        # z_i = seq[:, 0, :]
    theta_ref[0] = jnp.dot(loh_ref[0], h, preferred_element_type=jnp.float32)   # one-hot row gather


# --------------------------------- wrapper ---------------------------------
def pallas_fused_forward(x, add_mask, label_oh, params):
    B = x.shape[0]

    def bcast_spec(a):     # grid-invariant block (weights): fetched once, reused
        if a.ndim == 2:
            return pl.BlockSpec(a.shape, lambda b: (0, 0))
        return pl.BlockSpec(a.shape, lambda b: (0, 0, 0))

    def batch_spec(a):     # one batch element per grid step
        if a.ndim == 2:
            return pl.BlockSpec((1,) + tuple(a.shape[1:]), lambda b: (b, 0))
        return pl.BlockSpec((1,) + tuple(a.shape[1:]), lambda b: (b, 0, 0))

    weights = [params[k] for k in ("emb_ln_g", "emb_ln_b", "wqkv", "bqkv", "wo", "bo",
                                   "ln1_g", "ln1_b", "w1", "b1", "w2", "b2",
                                   "ln2_g", "ln2_b")]

    in_specs = ([batch_spec(x), batch_spec(add_mask)]
                + [bcast_spec(w) for w in weights]
                + [batch_spec(label_oh)])

    out_shape = (jax.ShapeDtypeStruct((B, 1, HIDDEN), jnp.float32),
                 jax.ShapeDtypeStruct((B, NUM_LABELS, HIDDEN), jnp.float32))
    out_specs = (pl.BlockSpec((1, 1, HIDDEN), lambda b: (b, 0, 0)),
                 pl.BlockSpec((1, NUM_LABELS, HIDDEN), lambda b: (b, 0, 0)))

    return pl.pallas_call(
        fused_forward_kernel,
        grid=(B,),
        in_specs=in_specs,
        out_specs=out_specs,
        out_shape=out_shape,
        compiler_params=pltpu.CompilerParams(dimension_semantics=("parallel",)),
    )(x, add_mask, *weights, label_oh)


# --------------------------------- parameters ---------------------------------
def init_params(key):
    def nrm(k, shape):
        return jax.random.normal(k, shape, jnp.float32) * 0.02

    ks = iter(jax.random.split(key, 16))
    L, H, I = LAYERS, HIDDEN, INTER
    return {
        "word_emb": nrm(next(ks), (VOCAB, H)),
        "pos_emb": nrm(next(ks), (SEQ, H)),
        "type_emb": nrm(next(ks), (2, H)),
        "emb_ln_g": jnp.ones((1, H), jnp.float32),
        "emb_ln_b": jnp.zeros((1, H), jnp.float32),
        # per-layer weights stacked on a leading layer axis; QKV pre-fused along columns
        "wqkv": nrm(next(ks), (L, H, 3 * H)),
        "bqkv": jnp.zeros((L, 1, 3 * H), jnp.float32),
        "wo": nrm(next(ks), (L, H, H)),
        "bo": jnp.zeros((L, 1, H), jnp.float32),
        "ln1_g": jnp.ones((L, 1, H), jnp.float32),
        "ln1_b": jnp.zeros((L, 1, H), jnp.float32),
        "w1": nrm(next(ks), (L, H, I)),
        "b1": jnp.zeros((L, 1, I), jnp.float32),
        "w2": nrm(next(ks), (L, I, H)),
        "b2": jnp.zeros((L, 1, H), jnp.float32),
        "ln2_g": jnp.ones((L, 1, H), jnp.float32),
        "ln2_b": jnp.zeros((L, 1, H), jnp.float32),
    }


# --------------------------------- forward ---------------------------------
def dual_cl_forward(params, input_ids, attention_mask, label_indices):
    B, S = input_ids.shape

    # Embedding table gathers stay in plain JAX (glue); everything after runs in the fused kernel.
    # TODO(synk): token_type_ids assumed all-zero (matches the reference module's default call).
    x = (params["word_emb"][input_ids]
         + params["pos_emb"][None, :, :]
         + params["type_emb"][0][None, None, :])                                   # (B, S, H)

    add_mask = ((1.0 - attention_mask.astype(jnp.float32)) * -10000.0)[:, None, :]  # (B, 1, S)
    label_oh = jax.nn.one_hot(label_indices, S, dtype=jnp.float32)                  # (B, NL, S)

    z, theta = pallas_fused_forward(x, add_mask, label_oh, params)
    return z.reshape(B, HIDDEN), theta                                               # (B,H), (B,NL,H)


# --------------------------------- main ---------------------------------
if __name__ == "__main__":
    key = jax.random.PRNGKey(0)
    k_param, k_ids, k_lbl = jax.random.split(key, 3)

    params = init_params(k_param)

    input_ids = jax.random.randint(k_ids, (BATCH, SEQ), 0, VOCAB, dtype=jnp.int32)
    attention_mask = jnp.ones((BATCH, SEQ), dtype=jnp.int32).at[:, SEQ - 1].set(0)
    label_indices = jax.random.randint(k_lbl, (BATCH, NUM_LABELS), 0, SEQ, dtype=jnp.int32)

    fwd = jax.jit(partial(dual_cl_forward, params))
    z_i, theta_i = fwd(input_ids, attention_mask, label_indices)
    jax.block_until_ready((z_i, theta_i))

    assert z_i.shape == (BATCH, HIDDEN)
    assert theta_i.shape == (BATCH, NUM_LABELS, HIDDEN)
    print("KERNEL_OK")
</pallas_src>

<mosaic_0001>
module attributes {stable_mosaic.version = 11 : i64} {
  func.func @fused_forward_kernel(%arg0: i32, %arg1: memref<1x8x32xf32, #tpu.memory_space<vmem>>, %arg2: memref<1x1x8xf32, #tpu.memory_space<vmem>>, %arg3: memref<1x32xf32, #tpu.memory_space<vmem>>, %arg4: memref<1x32xf32, #tpu.memory_space<vmem>>, %arg5: memref<2x32x96xf32, #tpu.memory_space<vmem>>, %arg6: memref<2x1x96xf32, #tpu.memory_space<vmem>>, %arg7: memref<2x32x32xf32, #tpu.memory_space<vmem>>, %arg8: memref<2x1x32xf32, #tpu.memory_space<vmem>>, %arg9: memref<2x1x32xf32, #tpu.memory_space<vmem>>, %arg10: memref<2x1x32xf32, #tpu.memory_space<vmem>>, %arg11: memref<2x32x64xf32, #tpu.memory_space<vmem>>, %arg12: memref<2x1x64xf32, #tpu.memory_space<vmem>>, %arg13: memref<2x64x32xf32, #tpu.memory_space<vmem>>, %arg14: memref<2x1x32xf32, #tpu.memory_space<vmem>>, %arg15: memref<2x1x32xf32, #tpu.memory_space<vmem>>, %arg16: memref<2x1x32xf32, #tpu.memory_space<vmem>>, %arg17: memref<1x3x8xf32, #tpu.memory_space<vmem>>, %arg18: memref<1x1x32xf32, #tpu.memory_space<vmem>>, %arg19: memref<1x3x32xf32, #tpu.memory_space<vmem>>) attributes {dimension_semantics = [#tpu.dimension_semantics<parallel>], iteration_bounds = array<i64: 2>, scalar_prefetch = 0 : i64, scratch_operands = 0 : i64, tpu.core_type = #tpu.core_type<tc>, window_params = [{transform_indices = @transform_0, window_bounds = array<i64: 1, 8, 32>}, {transform_indices = @transform_1, window_bounds = array<i64: 1, 1, 8>}, {pipeline_mode = #tpu.pipeline_mode<synchronous>, transform_indices = @transform_2, window_bounds = array<i64: 1, 32>}, {pipeline_mode = #tpu.pipeline_mode<synchronous>, transform_indices = @transform_3, window_bounds = array<i64: 1, 32>}, {pipeline_mode = #tpu.pipeline_mode<synchronous>, transform_indices = @transform_4, window_bounds = array<i64: 2, 32, 96>}, {pipeline_mode = #tpu.pipeline_mode<synchronous>, transform_indices = @transform_5, window_bounds = array<i64: 2, 1, 96>}, {pipeline_mode = #tpu.pipeline_mode<synchronous>, transform_indices = @transform_6, window_bounds = array<i64: 2, 32, 32>}, {pipeline_mode = #tpu.pipeline_mode<synchronous>, transform_indices = @transform_7, window_bounds = array<i64: 2, 1, 32>}, {pipeline_mode = #tpu.pipeline_mode<synchronous>, transform_indices = @transform_8, window_bounds = array<i64: 2, 1, 32>}, {pipeline_mode = #tpu.pipeline_mode<synchronous>, transform_indices = @transform_9, window_bounds = array<i64: 2, 1, 32>}, {pipeline_mode = #tpu.pipeline_mode<synchronous>, transform_indices = @transform_10, window_bounds = array<i64: 2, 32, 64>}, {pipeline_mode = #tpu.pipeline_mode<synchronous>, transform_indices = @transform_11, window_bounds = array<i64: 2, 1, 64>}, {pipeline_mode = #tpu.pipeline_mode<synchronous>, transform_indices = @transform_12, window_bounds = array<i64: 2, 64, 32>}, {pipeline_mode = #tpu.pipeline_mode<synchronous>, transform_indices = @transform_13, window_bounds = array<i64: 2, 1, 32>}, {pipeline_mode = #tpu.pipeline_mode<synchronous>, transform_indices = @transform_14, window_bounds = array<i64: 2, 1, 32>}, {pipeline_mode = #tpu.pipeline_mode<synchronous>, transform_indices = @transform_15, window_bounds = array<i64: 2, 1, 32>}, {transform_indices = @transform_16, window_bounds = array<i64: 1, 3, 8>}, {transform_indices = @transform_17, window_bounds = array<i64: 1, 1, 32>}, {transform_indices = @transform_18, window_bounds = array<i64: 1, 3, 32>}]} {
    %c0 = arith.constant 0 : index
    %c0_0 = arith.constant 0 : index
    %c0_1 = arith.constant 0 : index
    %0 = vector.load %arg1[%c0, %c0_0, %c0_1] : memref<1x8x32xf32, #tpu.memory_space<vmem>>, vector<1x8x32xf32>
    %1 = vector.shape_cast %0 : vector<1x8x32xf32> to vector<8x32xf32>
    %c0_2 = arith.constant 0 : index
    %c0_3 = arith.constant 0 : index
    %c0_4 = arith.constant 0 : index
    %2 = vector.load %arg2[%c0_2, %c0_3, %c0_4] : memref<1x1x8xf32, #tpu.memory_space<vmem>>, vector<1x1x8xf32>
    %3 = vector.shape_cast %2 : vector<1x1x8xf32> to vector<1x8xf32>
    %c0_5 = arith.constant 0 : index
    %c0_6 = arith.constant 0 : index
    %4 = vector.load %arg3[%c0_5, %c0_6] : memref<1x32xf32, #tpu.memory_space<vmem>>, vector<1x32xf32>
    %c0_7 = arith.constant 0 : index
    %c0_8 = arith.constant 0 : index
    %5 = vector.load %arg4[%c0_7, %c0_8] : memref<1x32xf32, #tpu.memory_space<vmem>>, vector<1x32xf32>
    %cst = arith.constant dense<0.000000e+00> : vector<8xf32>
    %6 = vector.multi_reduction <add>, %1, %cst [1] : vector<8x32xf32> to vector<8xf32>
    %7 = vector.shape_cast %6 : vector<8xf32> to vector<8x1xf32>
    %cst_9 = arith.constant 3.200000e+01 : f32
    %8 = vector.broadcast %cst_9 : f32 to vector<8x1xf32>
    %9 = arith.divf %7, %8 : vector<8x1xf32>
    %10 = vector.broadcast %9 : vector<8x1xf32> to vector<8x32xf32>
    %11 = arith.subf %1, %10 : vector<8x32xf32>
    %12 = arith.mulf %11, %11 : vector<8x32xf32>
    %cst_10 = arith.constant dense<0.000000e+00> : vector<8xf32>
    %13 = vector.multi_reduction <add>, %12, %cst_10 [1] : vector<8x32xf32> to vector<8xf32>
    %14 = vector.shape_cast %13 : vector<8xf32> to vector<8x1xf32>
    %cst_11 = arith.constant 3.200000e+01 : f32
    %15 = vector.broadcast %cst_11 : f32 to vector<8x1xf32>
    %16 = arith.divf %14, %15 : vector<8x1xf32>
    %17 = vector.broadcast %9 : vector<8x1xf32> to vector<8x32xf32>
    %18 = arith.subf %1, %17 : vector<8x32xf32>
    %cst_12 = arith.constant 9.99999996E-13 : f32
    %19 = vector.broadcast %cst_12 : f32 to vector<8x1xf32>
    %20 = arith.addf %16, %19 : vector<8x1xf32>
    %21 = math.rsqrt %20 : vector<8x1xf32>
    %22 = vector.broadcast %21 : vector<8x1xf32> to vector<8x32xf32>
    %23 = arith.mulf %18, %22 : vector<8x32xf32>
    %24 = vector.broadcast %4 : vector<1x32xf32> to vector<8x32xf32>
    %25 = arith.mulf %23, %24 : vector<8x32xf32>
    %26 = vector.broadcast %5 : vector<1x32xf32> to vector<8x32xf32>
    %27 = arith.addf %25, %26 : vector<8x32xf32>
    %c0_13 = arith.constant 0 : index
    %c0_14 = arith.constant 0 : index
    %c0_15 = arith.constant 0 : index
    %28 = vector.load %arg5[%c0_13, %c0_14, %c0_15] : memref<2x32x96xf32, #tpu.memory_space<vmem>>, vector<1x32x96xf32>
    %29 = vector.shape_cast %28 : vector<1x32x96xf32> to vector<32x96xf32>
    %cst_16 = arith.constant dense<0.000000e+00> : vector<8x96xf32>
    %30 = tpu.matmul %27, %29, %cst_16 {dimension_numbers = #tpu.dot_dimension_numbers<[1], [0], [0], [1], [0, 0, 1, 1], [], []>} : vector<8x32xf32>, vector<32x96xf32>, vector<8x96xf32> -> vector<8x96xf32>
    %c0_17 = arith.constant 0 : index
    %c0_18 = arith.constant 0 : index
    %c0_19 = arith.constant 0 : index
    %31 = vector.load %arg6[%c0_17, %c0_18, %c0_19] : memref<2x1x96xf32, #tpu.memory_space<vmem>>, vector<1x1x96xf32>
    %32 = vector.shape_cast %31 : vector<1x1x96xf32> to vector<1x96xf32>
    %33 = vector.broadcast %32 : vector<1x96xf32> to vector<8x96xf32>
    %34 = arith.addf %30, %33 : vector<8x96xf32>
    %c0_20 = arith.constant 0 : index
    %c0_21 = arith.constant 0 : index
    %c0_22 = arith.constant 0 : index
    %35 = vector.load %arg7[%c0_20, %c0_21, %c0_22] : memref<2x32x32xf32, #tpu.memory_space<vmem>>, vector<1x32x32xf32>
    %36 = vector.shape_cast %35 : vector<1x32x32xf32> to vector<32x32xf32>
    %cst_23 = arith.constant 0.000000e+00 : f32
    %37 = vector.broadcast %cst_23 : f32 to vector<8x32xf32>
    %38 = vector.extract_strided_slice %34 {offsets = [0, 0], sizes = [8, 8], strides = [1, 1]} : vector<8x96xf32> to vector<8x8xf32>
    %39 = vector.extract_strided_slice %34 {offsets = [0, 32], sizes = [8, 8], strides = [1, 1]} : vector<8x96xf32> to vector<8x8xf32>
    %40 = vector.extract_strided_slice %34 {offsets = [0, 64], sizes = [8, 8], strides = [1, 1]} : vector<8x96xf32> to vector<8x8xf32>
    %cst_24 = arith.constant dense<0.000000e+00> : vector<8x8xf32>
    %41 = tpu.matmul %38, %39, %cst_24 {dimension_numbers = #tpu.dot_dimension_numbers<[1], [1], [0], [0], [0, 0, 1, 0], [], []>} : vector<8x8xf32>, vector<8x8xf32>, vector<8x8xf32> -> vector<8x8xf32>
    %cst_25 = arith.constant 0.353553385 : f32
    %42 = vector.broadcast %cst_25 : f32 to vector<8x8xf32>
    %43 = arith.mulf %41, %42 : vector<8x8xf32>
    %44 = vector.broadcast %3 : vector<1x8xf32> to vector<8x8xf32>
    %45 = arith.addf %43, %44 : vector<8x8xf32>
    %cst_26 = arith.constant dense<0xFF800000> : vector<8xf32>
    %46 = vector.multi_reduction <maximumf>, %45, %cst_26 [1] : vector<8x8xf32> to vector<8xf32>
    %47 = vector.shape_cast %46 : vector<8xf32> to vector<8x1xf32>
    %48 = vector.broadcast %47 : vector<8x1xf32> to vector<8x8xf32>
    %49 = arith.subf %45, %48 : vector<8x8xf32>
    %50 = math.exp %49 : vector<8x8xf32>
    %cst_27 = arith.constant dense<0.000000e+00> : vector<8xf32>
    %51 = vector.multi_reduction <add>, %50, %cst_27 [1] : vector<8x8xf32> to vector<8xf32>
    %52 = vector.shape_cast %51 : vector<8xf32> to vector<8x1xf32>
    %53 = tpu.reciprocal %52 {approx = true} : vector<8x1xf32> -> vector<8x1xf32>
    %54 = vector.broadcast %53 : vector<8x1xf32> to vector<8x8xf32>
    %55 = arith.mulf %50, %54 : vector<8x8xf32>
    %cst_28 = arith.constant dense<0.000000e+00> : vector<8x8xf32>
    %56 = tpu.matmul %55, %40, %cst_28 {dimension_numbers = #tpu.dot_dimension_numbers<[1], [0], [0], [1], [0, 0, 1, 1], [], []>} : vector<8x8xf32>, vector<8x8xf32>, vector<8x8xf32> -> vector<8x8xf32>
    %57 = vector.extract_strided_slice %36 {offsets = [0, 0], sizes = [8, 32], strides = [1, 1]} : vector<32x32xf32> to vector<8x32xf32>
    %cst_29 = arith.constant dense<0.000000e+00> : vector<8x32xf32>
    %58 = tpu.matmul %56, %57, %cst_29 {dimension_numbers = #tpu.dot_dimension_numbers<[1], [0], [0], [1], [0, 0, 1, 1], [], []>} : vector<8x8xf32>, vector<8x32xf32>, vector<8x32xf32> -> vector<8x32xf32>
    %59 = arith.addf %37, %58 : vector<8x32xf32>
    %60 = vector.extract_strided_slice %34 {offsets = [0, 8], sizes = [8, 8], strides = [1, 1]} : vector<8x96xf32> to vector<8x8xf32>
    %61 = vector.extract_strided_slice %34 {offsets = [0, 40], sizes = [8, 8], strides = [1, 1]} : vector<8x96xf32> to vector<8x8xf32>
    %62 = vector.extract_strided_slice %34 {offsets = [0, 72], sizes = [8, 8], strides = [1, 1]} : vector<8x96xf32> to vector<8x8xf32>
    %cst_30 = arith.constant dense<0.000000e+00> : vector<8x8xf32>
    %63 = tpu.matmul %60, %61, %cst_30 {dimension_numbers = #tpu.dot_dimension_numbers<[1], [1], [0], [0], [0, 0, 1, 0], [], []>} : vector<8x8xf32>, vector<8x8xf32>, vector<8x8xf32> -> vector<8x8xf32>
    %cst_31 = arith.constant 0.353553385 : f32
    %64 = vector.broadcast %cst_31 : f32 to vector<8x8xf32>
    %65 = arith.mulf %63, %64 : vector<8x8xf32>
    %66 = vector.broadcast %3 : vector<1x8xf32> to vector<8x8xf32>
    %67 = arith.addf %65, %66 : vector<8x8xf32>
    %cst_32 = arith.constant dense<0xFF800000> : vector<8xf32>
    %68 = vector.multi_reduction <maximumf>, %67, %cst_32 [1] : vector<8x8xf32> to vector<8xf32>
    %69 = vector.shape_cast %68 : vector<8xf32> to vector<8x1xf32>
    %70 = vector.broadcast %69 : vector<8x1xf32> to vector<8x8xf32>
    %71 = arith.subf %67, %70 : vector<8x8xf32>
    %72 = math.exp %71 : vector<8x8xf32>
    %cst_33 = arith.constant dense<0.000000e+00> : vector<8xf32>
    %73 = vector.multi_reduction <add>, %72, %cst_33 [1] : vector<8x8xf32> to vector<8xf32>
    %74 = vector.shape_cast %73 : vector<8xf32> to vector<8x1xf32>
    %75 = tpu.reciprocal %74 {approx = true} : vector<8x1xf32> -> vector<8x1xf32>
    %76 = vector.broadcast %75 : vector<8x1xf32> to vector<8x8xf32>
    %77 = arith.mulf %72, %76 : vector<8x8xf32>
    %cst_34 = arith.constant dense<0.000000e+00> : vector<8x8xf32>
    %78 = tpu.matmul %77, %62, %cst_34 {dimension_numbers = #tpu.dot_dimension_numbers<[1], [0], [0], [1], [0, 0, 1, 1], [], []>} : vector<8x8xf32>, vector<8x8xf32>, vector<8x8xf32> -> vector<8x8xf32>
    %79 = vector.extract_strided_slice %36 {offsets = [8, 0], sizes = [8, 32], strides = [1, 1]} : vector<32x32xf32> to vector<8x32xf32>
    %cst_35 = arith.constant dense<0.000000e+00> : vector<8x32xf32>
    %80 = tpu.matmul %78, %79, %cst_35 {dimension_numbers = #tpu.dot_dimension_numbers<[1], [0], [0], [1], [0, 0, 1, 1], [], []>} : vector<8x8xf32>, vector<8x32xf32>, vector<8x32xf32> -> vector<8x32xf32>
    %81 = arith.addf %59, %80 : vector<8x32xf32>
    %82 = vector.extract_strided_slice %34 {offsets = [0, 16], sizes = [8, 8], strides = [1, 1]} : vector<8x96xf32> to vector<8x8xf32>
    %83 = vector.extract_strided_slice %34 {offsets = [0, 48], sizes = [8, 8], strides = [1, 1]} : vector<8x96xf32> to vector<8x8xf32>
    %84 = vector.extract_strided_slice %34 {offsets = [0, 80], sizes = [8, 8], strides = [1, 1]} : vector<8x96xf32> to vector<8x8xf32>
    %cst_36 = arith.constant dense<0.000000e+00> : vector<8x8xf32>
    %85 = tpu.matmul %82, %83, %cst_36 {dimension_numbers = #tpu.dot_dimension_numbers<[1], [1], [0], [0], [0, 0, 1, 0], [], []>} : vector<8x8xf32>, vector<8x8xf32>, vector<8x8xf32> -> vector<8x8xf32>
    %cst_37 = arith.constant 0.353553385 : f32
    %86 = vector.broadcast %cst_37 : f32 to vector<8x8xf32>
    %87 = arith.mulf %85, %86 : vector<8x8xf32>
    %88 = vector.broadcast %3 : vector<1x8xf32> to vector<8x8xf32>
    %89 = arith.addf %87, %88 : vector<8x8xf32>
    %cst_38 = arith.constant dense<0xFF800000> : vector<8xf32>
    %90 = vector.multi_reduction <maximumf>, %89, %cst_38 [1] : vector<8x8xf32> to vector<8xf32>
    %91 = vector.shape_cast %90 : vector<8xf32> to vector<8x1xf32>
    %92 = vector.broadcast %91 : vector<8x1xf32> to vector<8x8xf32>
    %93 = arith.subf %89, %92 : vector<8x8xf32>
    %94 = math.exp %93 : vector<8x8xf32>
    %cst_39 = arith.constant dense<0.000000e+00> : vector<8xf32>
    %95 = vector.multi_reduction <add>, %94, %cst_39 [1] : vector<8x8xf32> to vector<8xf32>
    %96 = vector.shape_cast %95 : vector<8xf32> to vector<8x1xf32>
    %97 = tpu.reciprocal %96 {approx = true} : vector<8x1xf32> -> vector<8x1xf32>
    %98 = vector.broadcast %97 : vector<8x1xf32> to vector<8x8xf32>
    %99 = arith.mulf %94, %98 : vector<8x8xf32>
    %cst_40 = arith.constant dense<0.000000e+00> : vector<8x8xf32>
    %100 = tpu.matmul %99, %84, %cst_40 {dimension_numbers = #tpu.dot_dimension_numbers<[1], [0], [0], [1], [0, 0, 1, 1], [], []>} : vector<8x8xf32>, vector<8x8xf32>, vector<8x8xf32> -> vector<8x8xf32>
    %101 = vector.extract_strided_slice %36 {offsets = [16, 0], sizes = [8, 32], strides = [1, 1]} : vector<32x32xf32> to vector<8x32xf32>
    %cst_41 = arith.constant dense<0.000000e+00> : vector<8x32xf32>
    %102 = tpu.matmul %100, %101, %cst_41 {dimension_numbers = #tpu.dot_dimension_numbers<[1], [0], [0], [1], [0, 0, 1, 1], [], []>} : vector<8x8xf32>, vector<8x32xf32>, vector<8x32xf32> -> vector<8x32xf32>
    %103 = arith.addf %81, %102 : vector<8x32xf32>
    %104 = vector.extract_strided_slice %34 {offsets = [0, 24], sizes = [8, 8], strides = [1, 1]} : vector<8x96xf32> to vector<8x8xf32>
    %105 = vector.extract_strided_slice %34 {offsets = [0, 56], sizes = [8, 8], strides = [1, 1]} : vector<8x96xf32> to vector<8x8xf32>
    %106 = vector.extract_strided_slice %34 {offsets = [0, 88], sizes = [8, 8], strides = [1, 1]} : vector<8x96xf32> to vector<8x8xf32>
    %cst_42 = arith.constant dense<0.000000e+00> : vector<8x8xf32>
    %107 = tpu.matmul %104, %105, %cst_42 {dimension_numbers = #tpu.dot_dimension_numbers<[1], [1], [0], [0], [0, 0, 1, 0], [], []>} : vector<8x8xf32>, vector<8x8xf32>, vector<8x8xf32> -> vector<8x8xf32>
    %cst_43 = arith.constant 0.353553385 : f32
    %108 = vector.broadcast %cst_43 : f32 to vector<8x8xf32>
    %109 = arith.mulf %107, %108 : vector<8x8xf32>
    %110 = vector.broadcast %3 : vector<1x8xf32> to vector<8x8xf32>
    %111 = arith.addf %109, %110 : vector<8x8xf32>
    %cst_44 = arith.constant dense<0xFF800000> : vector<8xf32>
    %112 = vector.multi_reduction <maximumf>, %111, %cst_44 [1] : vector<8x8xf32> to vector<8xf32>
    %113 = vector.shape_cast %112 : vector<8xf32> to vector<8x1xf32>
    %114 = vector.broadcast %113 : vector<8x1xf32> to vector<8x8xf32>
    %115 = arith.subf %111, %114 : vector<8x8xf32>
    %116 = math.exp %115 : vector<8x8xf32>
    %cst_45 = arith.constant dense<0.000000e+00> : vector<8xf32>
    %117 = vector.multi_reduction <add>, %116, %cst_45 [1] : vector<8x8xf32> to vector<8xf32>
    %118 = vector.shape_cast %117 : vector<8xf32> to vector<8x1xf32>
    %119 = tpu.reciprocal %118 {approx = true} : vector<8x1xf32> -> vector<8x1xf32>
    %120 = vector.broadcast %119 : vector<8x1xf32> to vector<8x8xf32>
    %121 = arith.mulf %116, %120 : vector<8x8xf32>
    %cst_46 = arith.constant dense<0.000000e+00> : vector<8x8xf32>
    %122 = tpu.matmul %121, %106, %cst_46 {dimension_numbers = #tpu.dot_dimension_numbers<[1], [0], [0], [1], [0, 0, 1, 1], [], []>} : vector<8x8xf32>, vector<8x8xf32>, vector<8x8xf32> -> vector<8x8xf32>
    %123 = vector.extract_strided_slice %36 {offsets = [24, 0], sizes = [8, 32], strides = [1, 1]} : vector<32x32xf32> to vector<8x32xf32>
    %cst_47 = arith.constant dense<0.000000e+00> : vector<8x32xf32>
    %124 = tpu.matmul %122, %123, %cst_47 {dimension_numbers = #tpu.dot_dimension_numbers<[1], [0], [0], [1], [0, 0, 1, 1], [], []>} : vector<8x8xf32>, vector<8x32xf32>, vector<8x32xf32> -> vector<8x32xf32>
    %125 = arith.addf %103, %124 : vector<8x32xf32>
    %c0_48 = arith.constant 0 : index
    %c0_49 = arith.constant 0 : index
    %c0_50 = arith.constant 0 : index
    %126 = vector.load %arg8[%c0_48, %c0_49, %c0_50] : memref<2x1x32xf32, #tpu.memory_space<vmem>>, vector<1x1x32xf32>
    %127 = vector.shape_cast %126 : vector<1x1x32xf32> to vector<1x32xf32>
    %128 = vector.broadcast %127 : vector<1x32xf32> to vector<8x32xf32>
    %129 = arith.addf %125, %128 : vector<8x32xf32>
    %130 = arith.addf %129, %27 : vector<8x32xf32>
    %c0_51 = arith.constant 0 : index
    %c0_52 = arith.constant 0 : index
    %c0_53 = arith.constant 0 : index
    %131 = vector.load %arg9[%c0_51, %c0_52, %c0_53] : memref<2x1x32xf32, #tpu.memory_space<vmem>>, vector<1x1x32xf32>
    %132 = vector.shape_cast %131 : vector<1x1x32xf32> to vector<1x32xf32>
    %c0_54 = arith.constant 0 : index
    %c0_55 = arith.constant 0 : index
    %c0_56 = arith.constant 0 : index
    %133 = vector.load %arg10[%c0_54, %c0_55, %c0_56] : memref<2x1x32xf32, #tpu.memory_space<vmem>>, vector<1x1x32xf32>
    %134 = vector.shape_cast %133 : vector<1x1x32xf32> to vector<1x32xf32>
    %cst_57 = arith.constant dense<0.000000e+00> : vector<8xf32>
    %135 = vector.multi_reduction <add>, %130, %cst_57 [1] : vector<8x32xf32> to vector<8xf32>
    %136 = vector.shape_cast %135 : vector<8xf32> to vector<8x1xf32>
    %cst_58 = arith.constant 3.200000e+01 : f32
    %137 = vector.broadcast %cst_58 : f32 to vector<8x1xf32>
    %138 = arith.divf %136, %137 : vector<8x1xf32>
    %139 = vector.broadcast %138 : vector<8x1xf32> to vector<8x32xf32>
    %140 = arith.subf %130, %139 : vector<8x32xf32>
    %141 = arith.mulf %140, %140 : vector<8x32xf32>
    %cst_59 = arith.constant dense<0.000000e+00> : vector<8xf32>
    %142 = vector.multi_reduction <add>, %141, %cst_59 [1] : vector<8x32xf32> to vector<8xf32>
    %143 = vector.shape_cast %142 : vector<8xf32> to vector<8x1xf32>
    %cst_60 = arith.constant 3.200000e+01 : f32
    %144 = vector.broadcast %cst_60 : f32 to vector<8x1xf32>
    %145 = arith.divf %143, %144 : vector<8x1xf32>
    %146 = vector.broadcast %138 : vector<8x1xf32> to vector<8x32xf32>
    %147 = arith.subf %130, %146 : vector<8x32xf32>
    %cst_61 = arith.constant 9.99999996E-13 : f32
    %148 = vector.broadcast %cst_61 : f32 to vector<8x1xf32>
    %149 = arith.addf %145, %148 : vector<8x1xf32>
    %150 = math.rsqrt %149 : vector<8x1xf32>
    %151 = vector.broadcast %150 : vector<8x1xf32> to vector<8x32xf32>
    %152 = arith.mulf %147, %151 : vector<8x32xf32>
    %153 = vector.broadcast %132 : vector<1x32xf32> to vector<8x32xf32>
    %154 = arith.mulf %152, %153 : vector<8x32xf32>
    %155 = vector.broadcast %134 : vector<1x32xf32> to vector<8x32xf32>
    %156 = arith.addf %154, %155 : vector<8x32xf32>
    %c0_62 = arith.constant 0 : index
    %c0_63 = arith.constant 0 : index
    %c0_64 = arith.constant 0 : index
    %157 = vector.load %arg11[%c0_62, %c0_63, %c0_64] : memref<2x32x64xf32, #tpu.memory_space<vmem>>, vector<1x32x64xf32>
    %158 = vector.shape_cast %157 : vector<1x32x64xf32> to vector<32x64xf32>
    %cst_65 = arith.constant dense<0.000000e+00> : vector<8x64xf32>
    %159 = tpu.matmul %156, %158, %cst_65 {dimension_numbers = #tpu.dot_dimension_numbers<[1], [0], [0], [1], [0, 0, 1, 1], [], []>} : vector<8x32xf32>, vector<32x64xf32>, vector<8x64xf32> -> vector<8x64xf32>
    %c0_66 = arith.constant 0 : index
    %c0_67 = arith.constant 0 : index
    %c0_68 = arith.constant 0 : index
    %160 = vector.load %arg12[%c0_66, %c0_67, %c0_68] : memref<2x1x64xf32, #tpu.memory_space<vmem>>, vector<1x1x64xf32>
    %161 = vector.shape_cast %160 : vector<1x1x64xf32> to vector<1x64xf32>
    %162 = vector.broadcast %161 : vector<1x64xf32> to vector<8x64xf32>
    %163 = arith.addf %159, %162 : vector<8x64xf32>
    %cst_69 = arith.constant 5.000000e-01 : f32
    %164 = vector.broadcast %cst_69 : f32 to vector<8x64xf32>
    %165 = arith.mulf %164, %163 : vector<8x64xf32>
    %cst_70 = arith.constant 4.471500e-02 : f32
    %166 = vector.broadcast %cst_70 : f32 to vector<8x64xf32>
    %167 = arith.mulf %166, %163 : vector<8x64xf32>
    %168 = arith.mulf %167, %163 : vector<8x64xf32>
    %169 = arith.mulf %168, %163 : vector<8x64xf32>
    %170 = arith.addf %163, %169 : vector<8x64xf32>
    %cst_71 = arith.constant 0.797884583 : f32
    %171 = vector.broadcast %cst_71 : f32 to vector<8x64xf32>
    %172 = arith.mulf %171, %170 : vector<8x64xf32>
    %173 = math.tanh %172 : vector<8x64xf32>
    %cst_72 = arith.constant 1.000000e+00 : f32
    %174 = vector.broadcast %cst_72 : f32 to vector<8x64xf32>
    %175 = arith.addf %174, %173 : vector<8x64xf32>
    %176 = arith.mulf %165, %175 : vector<8x64xf32>
    %c0_73 = arith.constant 0 : index
    %c0_74 = arith.constant 0 : index
    %c0_75 = arith.constant 0 : index
    %177 = vector.load %arg13[%c0_73, %c0_74, %c0_75] : memref<2x64x32xf32, #tpu.memory_space<vmem>>, vector<1x64x32xf32>
    %178 = vector.shape_cast %177 : vector<1x64x32xf32> to vector<64x32xf32>
    %cst_76 = arith.constant dense<0.000000e+00> : vector<8x32xf32>
    %179 = tpu.matmul %176, %178, %cst_76 {dimension_numbers = #tpu.dot_dimension_numbers<[1], [0], [0], [1], [0, 0, 1, 1], [], []>} : vector<8x64xf32>, vector<64x32xf32>, vector<8x32xf32> -> vector<8x32xf32>
    %c0_77 = arith.constant 0 : index
    %c0_78 = arith.constant 0 : index
    %c0_79 = arith.constant 0 : index
    %180 = vector.load %arg14[%c0_77, %c0_78, %c0_79] : memref<2x1x32xf32, #tpu.memory_space<vmem>>, vector<1x1x32xf32>
    %181 = vector.shape_cast %180 : vector<1x1x32xf32> to vector<1x32xf32>
    %182 = vector.broadcast %181 : vector<1x32xf32> to vector<8x32xf32>
    %183 = arith.addf %179, %182 : vector<8x32xf32>
    %184 = arith.addf %183, %156 : vector<8x32xf32>
    %c0_80 = arith.constant 0 : index
    %c0_81 = arith.constant 0 : index
    %c0_82 = arith.constant 0 : index
    %185 = vector.load %arg15[%c0_80, %c0_81, %c0_82] : memref<2x1x32xf32, #tpu.memory_space<vmem>>, vector<1x1x32xf32>
    %186 = vector.shape_cast %185 : vector<1x1x32xf32> to vector<1x32xf32>
    %c0_83 = arith.constant 0 : index
    %c0_84 = arith.constant 0 : index
    %c0_85 = arith.constant 0 : index
    %187 = vector.load %arg16[%c0_83, %c0_84, %c0_85] : memref<2x1x32xf32, #tpu.memory_space<vmem>>, vector<1x1x32xf32>
    %188 = vector.shape_cast %187 : vector<1x1x32xf32> to vector<1x32xf32>
    %cst_86 = arith.constant dense<0.000000e+00> : vector<8xf32>
    %189 = vector.multi_reduction <add>, %184, %cst_86 [1] : vector<8x32xf32> to vector<8xf32>
    %190 = vector.shape_cast %189 : vector<8xf32> to vector<8x1xf32>
    %cst_87 = arith.constant 3.200000e+01 : f32
    %191 = vector.broadcast %cst_87 : f32 to vector<8x1xf32>
    %192 = arith.divf %190, %191 : vector<8x1xf32>
    %193 = vector.broadcast %192 : vector<8x1xf32> to vector<8x32xf32>
    %194 = arith.subf %184, %193 : vector<8x32xf32>
    %195 = arith.mulf %194, %194 : vector<8x32xf32>
    %cst_88 = arith.constant dense<0.000000e+00> : vector<8xf32>
    %196 = vector.multi_reduction <add>, %195, %cst_88 [1] : vector<8x32xf32> to vector<8xf32>
    %197 = vector.shape_cast %196 : vector<8xf32> to vector<8x1xf32>
    %cst_89 = arith.constant 3.200000e+01 : f32
    %198 = vector.broadcast %cst_89 : f32 to vector<8x1xf32>
    %199 = arith.divf %197, %198 : vector<8x1xf32>
    %200 = vector.broadcast %192 : vector<8x1xf32> to vector<8x32xf32>
    %201 = arith.subf %184, %200 : vector<8x32xf32>
    %cst_90 = arith.constant 9.99999996E-13 : f32
    %202 = vector.broadcast %cst_90 : f32 to vector<8x1xf32>
    %203 = arith.addf %199, %202 : vector<8x1xf32>
    %204 = math.rsqrt %203 : vector<8x1xf32>
    %205 = vector.broadcast %204 : vector<8x1xf32> to vector<8x32xf32>
    %206 = arith.mulf %201, %205 : vector<8x32xf32>
    %207 = vector.broadcast %186 : vector<1x32xf32> to vector<8x32xf32>
    %208 = arith.mulf %206, %207 : vector<8x32xf32>
    %209 = vector.broadcast %188 : vector<1x32xf32> to vector<8x32xf32>
    %210 = arith.addf %208, %209 : vector<8x32xf32>
    %c1 = arith.constant 1 : index
    %c0_91 = arith.constant 0 : index
    %c0_92 = arith.constant 0 : index
    %211 = vector.load %arg5[%c1, %c0_91, %c0_92] : memref<2x32x96xf32, #tpu.memory_space<vmem>>, vector<1x32x96xf32>
    %212 = vector.shape_cast %211 : vector<1x32x96xf32> to vector<32x96xf32>
    %cst_93 = arith.constant dense<0.000000e+00> : vector<8x96xf32>
    %213 = tpu.matmul %210, %212, %cst_93 {dimension_numbers = #tpu.dot_dimension_numbers<[1], [0], [0], [1], [0, 0, 1, 1], [], []>} : vector<8x32xf32>, vector<32x96xf32>, vector<8x96xf32> -> vector<8x96xf32>
    %c1_94 = arith.constant 1 : index
    %c0_95 = arith.constant 0 : index
    %c0_96 = arith.constant 0 : index
    %214 = vector.load %arg6[%c1_94, %c0_95, %c0_96] : memref<2x1x96xf32, #tpu.memory_space<vmem>>, vector<1x1x96xf32>
    %215 = vector.shape_cast %214 : vector<1x1x96xf32> to vector<1x96xf32>
    %216 = vector.broadcast %215 : vector<1x96xf32> to vector<8x96xf32>
    %217 = arith.addf %213, %216 : vector<8x96xf32>
    %c1_97 = arith.constant 1 : index
    %c0_98 = arith.constant 0 : index
    %c0_99 = arith.constant 0 : index
    %218 = vector.load %arg7[%c1_97, %c0_98, %c0_99] : memref<2x32x32xf32, #tpu.memory_space<vmem>>, vector<1x32x32xf32>
    %219 = vector.shape_cast %218 : vector<1x32x32xf32> to vector<32x32xf32>
    %cst_100 = arith.constant 0.000000e+00 : f32
    %220 = vector.broadcast %cst_100 : f32 to vector<8x32xf32>
    %221 = vector.extract_strided_slice %217 {offsets = [0, 0], sizes = [8, 8], strides = [1, 1]} : vector<8x96xf32> to vector<8x8xf32>
    %222 = vector.extract_strided_slice %217 {offsets = [0, 32], sizes = [8, 8], strides = [1, 1]} : vector<8x96xf32> to vector<8x8xf32>
    %223 = vector.extract_strided_slice %217 {offsets = [0, 64], sizes = [8, 8], strides = [1, 1]} : vector<8x96xf32> to vector<8x8xf32>
    %cst_101 = arith.constant dense<0.000000e+00> : vector<8x8xf32>
    %224 = tpu.matmul %221, %222, %cst_101 {dimension_numbers = #tpu.dot_dimension_numbers<[1], [1], [0], [0], [0, 0, 1, 0], [], []>} : vector<8x8xf32>, vector<8x8xf32>, vector<8x8xf32> -> vector<8x8xf32>
    %cst_102 = arith.constant 0.353553385 : f32
    %225 = vector.broadcast %cst_102 : f32 to vector<8x8xf32>
    %226 = arith.mulf %224, %225 : vector<8x8xf32>
    %227 = vector.broadcast %3 : vector<1x8xf32> to vector<8x8xf32>
    %228 = arith.addf %226, %227 : vector<8x8xf32>
    %cst_103 = arith.constant dense<0xFF800000> : vector<8xf32>
    %229 = vector.multi_reduction <maximumf>, %228, %cst_103 [1] : vector<8x8xf32> to vector<8xf32>
    %230 = vector.shape_cast %229 : vector<8xf32> to vector<8x1xf32>
    %231 = vector.broadcast %230 : vector<8x1xf32> to vector<8x8xf32>
    %232 = arith.subf %228, %231 : vector<8x8xf32>
    %233 = math.exp %232 : vector<8x8xf32>
    %cst_104 = arith.constant dense<0.000000e+00> : vector<8xf32>
    %234 = vector.multi_reduction <add>, %233, %cst_104 [1] : vector<8x8xf32> to vector<8xf32>
    %235 = vector.shape_cast %234 : vector<8xf32> to vector<8x1xf32>
    %236 = tpu.reciprocal %235 {approx = true} : vector<8x1xf32> -> vector<8x1xf32>
    %237 = vector.broadcast %236 : vector<8x1xf32> to vector<8x8xf32>
    %238 = arith.mulf %233, %237 : vector<8x8xf32>
    %cst_105 = arith.constant dense<0.000000e+00> : vector<8x8xf32>
    %239 = tpu.matmul %238, %223, %cst_105 {dimension_numbers = #tpu.dot_dimension_numbers<[1], [0], [0], [1], [0, 0, 1, 1], [], []>} : vector<8x8xf32>, vector<8x8xf32>, vector<8x8xf32> -> vector<8x8xf32>
    %240 = vector.extract_strided_slice %219 {offsets = [0, 0], sizes = [8, 32], strides = [1, 1]} : vector<32x32xf32> to vector<8x32xf32>
    %cst_106 = arith.constant dense<0.000000e+00> : vector<8x32xf32>
    %241 = tpu.matmul %239, %240, %cst_106 {dimension_numbers = #tpu.dot_dimension_numbers<[1], [0], [0], [1], [0, 0, 1, 1], [], []>} : vector<8x8xf32>, vector<8x32xf32>, vector<8x32xf32> -> vector<8x32xf32>
    %242 = arith.addf %220, %241 : vector<8x32xf32>
    %243 = vector.extract_strided_slice %217 {offsets = [0, 8], sizes = [8, 8], strides = [1, 1]} : vector<8x96xf32> to vector<8x8xf32>
    %244 = vector.extract_strided_slice %217 {offsets = [0, 40], sizes = [8, 8], strides = [1, 1]} : vector<8x96xf32> to vector<8x8xf32>
    %245 = vector.extract_strided_slice %217 {offsets = [0, 72], sizes = [8, 8], strides = [1, 1]} : vector<8x96xf32> to vector<8x8xf32>
    %cst_107 = arith.constant dense<0.000000e+00> : vector<8x8xf32>
    %246 = tpu.matmul %243, %244, %cst_107 {dimension_numbers = #tpu.dot_dimension_numbers<[1], [1], [0], [0], [0, 0, 1, 0], [], []>} : vector<8x8xf32>, vector<8x8xf32>, vector<8x8xf32> -> vector<8x8xf32>
    %cst_108 = arith.constant 0.353553385 : f32
    %247 = vector.broadcast %cst_108 : f32 to vector<8x8xf32>
    %248 = arith.mulf %246, %247 : vector<8x8xf32>
    %249 = vector.broadcast %3 : vector<1x8xf32> to vector<8x8xf32>
    %250 = arith.addf %248, %249 : vector<8x8xf32>
    %cst_109 = arith.constant dense<0xFF800000> : vector<8xf32>
    %251 = vector.multi_reduction <maximumf>, %250, %cst_109 [1] : vector<8x8xf32> to vector<8xf32>
    %252 = vector.shape_cast %251 : vector<8xf32> to vector<8x1xf32>
    %253 = vector.broadcast %252 : vector<8x1xf32> to vector<8x8xf32>
    %254 = arith.subf %250, %253 : vector<8x8xf32>
    %255 = math.exp %254 : vector<8x8xf32>
    %cst_110 = arith.constant dense<0.000000e+00> : vector<8xf32>
    %256 = vector.multi_reduction <add>, %255, %cst_110 [1] : vector<8x8xf32> to vector<8xf32>
    %257 = vector.shape_cast %256 : vector<8xf32> to vector<8x1xf32>
    %258 = tpu.reciprocal %257 {approx = true} : vector<8x1xf32> -> vector<8x1xf32>
    %259 = vector.broadcast %258 : vector<8x1xf32> to vector<8x8xf32>
    %260 = arith.mulf %255, %259 : vector<8x8xf32>
    %cst_111 = arith.constant dense<0.000000e+00> : vector<8x8xf32>
    %261 = tpu.matmul %260, %245, %cst_111 {dimension_numbers = #tpu.dot_dimension_numbers<[1], [0], [0], [1], [0, 0, 1, 1], [], []>} : vector<8x8xf32>, vector<8x8xf32>, vector<8x8xf32> -> vector<8x8xf32>
    %262 = vector.extract_strided_slice %219 {offsets = [8, 0], sizes = [8, 32], strides = [1, 1]} : vector<32x32xf32> to vector<8x32xf32>
    %cst_112 = arith.constant dense<0.000000e+00> : vector<8x32xf32>
    %263 = tpu.matmul %261, %262, %cst_112 {dimension_numbers = #tpu.dot_dimension_numbers<[1], [0], [0], [1], [0, 0, 1, 1], [], []>} : vector<8x8xf32>, vector<8x32xf32>, vector<8x32xf32> -> vector<8x32xf32>
    %264 = arith.addf %242, %263 : vector<8x32xf32>
    %265 = vector.extract_strided_slice %217 {offsets = [0, 16], sizes = [8, 8], strides = [1, 1]} : vector<8x96xf32> to vector<8x8xf32>
    %266 = vector.extract_strided_slice %217 {offsets = [0, 48], sizes = [8, 8], strides = [1, 1]} : vector<8x96xf32> to vector<8x8xf32>
    %267 = vector.extract_strided_slice %217 {offsets = [0, 80], sizes = [8, 8], strides = [1, 1]} : vector<8x96xf32> to vector<8x8xf32>
    %cst_113 = arith.constant dense<0.000000e+00> : vector<8x8xf32>
    %268 = tpu.matmul %265, %266, %cst_113 {dimension_numbers = #tpu.dot_dimension_numbers<[1], [1], [0], [0], [0, 0, 1, 0], [], []>} : vector<8x8xf32>, vector<8x8xf32>, vector<8x8xf32> -> vector<8x8xf32>
    %cst_114 = arith.constant 0.353553385 : f32
    %269 = vector.broadcast %cst_114 : f32 to vector<8x8xf32>
    %270 = arith.mulf %268, %269 : vector<8x8xf32>
    %271 = vector.broadcast %3 : vector<1x8xf32> to vector<8x8xf32>
    %272 = arith.addf %270, %271 : vector<8x8xf32>
    %cst_115 = arith.constant dense<0xFF800000> : vector<8xf32>
    %273 = vector.multi_reduction <maximumf>, %272, %cst_115 [1] : vector<8x8xf32> to vector<8xf32>
    %274 = vector.shape_cast %273 : vector<8xf32> to vector<8x1xf32>
    %275 = vector.broadcast %274 : vector<8x1xf32> to vector<8x8xf32>
    %276 = arith.subf %272, %275 : vector<8x8xf32>
    %277 = math.exp %276 : vector<8x8xf32>
    %cst_116 = arith.constant dense<0.000000e+00> : vector<8xf32>
    %278 = vector.multi_reduction <add>, %277, %cst_116 [1] : vector<8x8xf32> to vector<8xf32>
    %279 = vector.shape_cast %278 : vector<8xf32> to vector<8x1xf32>
    %280 = tpu.reciprocal %279 {approx = true} : vector<8x1xf32> -> vector<8x1xf32>
    %281 = vector.broadcast %280 : vector<8x1xf32> to vector<8x8xf32>
    %282 = arith.mulf %277, %281 : vector<8x8xf32>
    %cst_117 = arith.constant dense<0.000000e+00> : vector<8x8xf32>
    %283 = tpu.matmul %282, %267, %cst_117 {dimension_numbers = #tpu.dot_dimension_numbers<[1], [0], [0], [1], [0, 0, 1, 1], [], []>} : vector<8x8xf32>, vector<8x8xf32>, vector<8x8xf32> -> vector<8x8xf32>
    %284 = vector.extract_strided_slice %219 {offsets = [16, 0], sizes = [8, 32], strides = [1, 1]} : vector<32x32xf32> to vector<8x32xf32>
    %cst_118 = arith.constant dense<0.000000e+00> : vector<8x32xf32>
    %285 = tpu.matmul %283, %284, %cst_118 {dimension_numbers = #tpu.dot_dimension_numbers<[1], [0], [0], [1], [0, 0, 1, 1], [], []>} : vector<8x8xf32>, vector<8x32xf32>, vector<8x32xf32> -> vector<8x32xf32>
    %286 = arith.addf %264, %285 : vector<8x32xf32>
    %287 = vector.extract_strided_slice %217 {offsets = [0, 24], sizes = [8, 8], strides = [1, 1]} : vector<8x96xf32> to vector<8x8xf32>
    %288 = vector.extract_strided_slice %217 {offsets = [0, 56], sizes = [8, 8], strides = [1, 1]} : vector<8x96xf32> to vector<8x8xf32>
    %289 = vector.extract_strided_slice %217 {offsets = [0, 88], sizes = [8, 8], strides = [1, 1]} : vector<8x96xf32> to vector<8x8xf32>
    %cst_119 = arith.constant dense<0.000000e+00> : vector<8x8xf32>
    %290 = tpu.matmul %287, %288, %cst_119 {dimension_numbers = #tpu.dot_dimension_numbers<[1], [1], [0], [0], [0, 0, 1, 0], [], []>} : vector<8x8xf32>, vector<8x8xf32>, vector<8x8xf32> -> vector<8x8xf32>
    %cst_120 = arith.constant 0.353553385 : f32
    %291 = vector.broadcast %cst_120 : f32 to vector<8x8xf32>
    %292 = arith.mulf %290, %291 : vector<8x8xf32>
    %293 = vector.broadcast %3 : vector<1x8xf32> to vector<8x8xf32>
    %294 = arith.addf %292, %293 : vector<8x8xf32>
    %cst_121 = arith.constant dense<0xFF800000> : vector<8xf32>
    %295 = vector.multi_reduction <maximumf>, %294, %cst_121 [1] : vector<8x8xf32> to vector<8xf32>
    %296 = vector.shape_cast %295 : vector<8xf32> to vector<8x1xf32>
    %297 = vector.broadcast %296 : vector<8x1xf32> to vector<8x8xf32>
    %298 = arith.subf %294, %297 : vector<8x8xf32>
    %299 = math.exp %298 : vector<8x8xf32>
    %cst_122 = arith.constant dense<0.000000e+00> : vector<8xf32>
    %300 = vector.multi_reduction <add>, %299, %cst_122 [1] : vector<8x8xf32> to vector<8xf32>
    %301 = vector.shape_cast %300 : vector<8xf32> to vector<8x1xf32>
    %302 = tpu.reciprocal %301 {approx = true} : vector<8x1xf32> -> vector<8x1xf32>
    %303 = vector.broadcast %302 : vector<8x1xf32> to vector<8x8xf32>
    %304 = arith.mulf %299, %303 : vector<8x8xf32>
    %cst_123 = arith.constant dense<0.000000e+00> : vector<8x8xf32>
    %305 = tpu.matmul %304, %289, %cst_123 {dimension_numbers = #tpu.dot_dimension_numbers<[1], [0], [0], [1], [0, 0, 1, 1], [], []>} : vector<8x8xf32>, vector<8x8xf32>, vector<8x8xf32> -> vector<8x8xf32>
    %306 = vector.extract_strided_slice %219 {offsets = [24, 0], sizes = [8, 32], strides = [1, 1]} : vector<32x32xf32> to vector<8x32xf32>
    %cst_124 = arith.constant dense<0.000000e+00> : vector<8x32xf32>
    %307 = tpu.matmul %305, %306, %cst_124 {dimension_numbers = #tpu.dot_dimension_numbers<[1], [0], [0], [1], [0, 0, 1, 1], [], []>} : vector<8x8xf32>, vector<8x32xf32>, vector<8x32xf32> -> vector<8x32xf32>
    %308 = arith.addf %286, %307 : vector<8x32xf32>
    %c1_125 = arith.constant 1 : index
    %c0_126 = arith.constant 0 : index
    %c0_127 = arith.constant 0 : index
    %309 = vector.load %arg8[%c1_125, %c0_126, %c0_127] : memref<2x1x32xf32, #tpu.memory_space<vmem>>, vector<1x1x32xf32>
    %310 = vector.shape_cast %309 : vector<1x1x32xf32> to vector<1x32xf32>
    %311 = vector.broadcast %310 : vector<1x32xf32> to vector<8x32xf32>
    %312 = arith.addf %308, %311 : vector<8x32xf32>
    %313 = arith.addf %312, %210 : vector<8x32xf32>
    %c1_128 = arith.constant 1 : index
    %c0_129 = arith.constant 0 : index
    %c0_130 = arith.constant 0 : index
    %314 = vector.load %arg9[%c1_128, %c0_129, %c0_130] : memref<2x1x32xf32, #tpu.memory_space<vmem>>, vector<1x1x32xf32>
    %315 = vector.shape_cast %314 : vector<1x1x32xf32> to vector<1x32xf32>
    %c1_131 = arith.constant 1 : index
    %c0_132 = arith.constant 0 : index
    %c0_133 = arith.constant 0 : index
    %316 = vector.load %arg10[%c1_131, %c0_132, %c0_133] : memref<2x1x32xf32, #tpu.memory_space<vmem>>, vector<1x1x32xf32>
    %317 = vector.shape_cast %316 : vector<1x1x32xf32> to vector<1x32xf32>
    %cst_134 = arith.constant dense<0.000000e+00> : vector<8xf32>
    %318 = vector.multi_reduction <add>, %313, %cst_134 [1] : vector<8x32xf32> to vector<8xf32>
    %319 = vector.shape_cast %318 : vector<8xf32> to vector<8x1xf32>
    %cst_135 = arith.constant 3.200000e+01 : f32
    %320 = vector.broadcast %cst_135 : f32 to vector<8x1xf32>
    %321 = arith.divf %319, %320 : vector<8x1xf32>
    %322 = vector.broadcast %321 : vector<8x1xf32> to vector<8x32xf32>
    %323 = arith.subf %313, %322 : vector<8x32xf32>
    %324 = arith.mulf %323, %323 : vector<8x32xf32>
    %cst_136 = arith.constant dense<0.000000e+00> : vector<8xf32>
    %325 = vector.multi_reduction <add>, %324, %cst_136 [1] : vector<8x32xf32> to vector<8xf32>
    %326 = vector.shape_cast %325 : vector<8xf32> to vector<8x1xf32>
    %cst_137 = arith.constant 3.200000e+01 : f32
    %327 = vector.broadcast %cst_137 : f32 to vector<8x1xf32>
    %328 = arith.divf %326, %327 : vector<8x1xf32>
    %329 = vector.broadcast %321 : vector<8x1xf32> to vector<8x32xf32>
    %330 = arith.subf %313, %329 : vector<8x32xf32>
    %cst_138 = arith.constant 9.99999996E-13 : f32
    %331 = vector.broadcast %cst_138 : f32 to vector<8x1xf32>
    %332 = arith.addf %328, %331 : vector<8x1xf32>
    %333 = math.rsqrt %332 : vector<8x1xf32>
    %334 = vector.broadcast %333 : vector<8x1xf32> to vector<8x32xf32>
    %335 = arith.mulf %330, %334 : vector<8x32xf32>
    %336 = vector.broadcast %315 : vector<1x32xf32> to vector<8x32xf32>
    %337 = arith.mulf %335, %336 : vector<8x32xf32>
    %338 = vector.broadcast %317 : vector<1x32xf32> to vector<8x32xf32>
    %339 = arith.addf %337, %338 : vector<8x32xf32>
    %c1_139 = arith.constant 1 : index
    %c0_140 = arith.constant 0 : index
    %c0_141 = arith.constant 0 : index
    %340 = vector.load %arg11[%c1_139, %c0_140, %c0_141] : memref<2x32x64xf32, #tpu.memory_space<vmem>>, vector<1x32x64xf32>
    %341 = vector.shape_cast %340 : vector<1x32x64xf32> to vector<32x64xf32>
    %cst_142 = arith.constant dense<0.000000e+00> : vector<8x64xf32>
    %342 = tpu.matmul %339, %341, %cst_142 {dimension_numbers = #tpu.dot_dimension_numbers<[1], [0], [0], [1], [0, 0, 1, 1], [], []>} : vector<8x32xf32>, vector<32x64xf32>, vector<8x64xf32> -> vector<8x64xf32>
    %c1_143 = arith.constant 1 : index
    %c0_144 = arith.constant 0 : index
    %c0_145 = arith.constant 0 : index
    %343 = vector.load %arg12[%c1_143, %c0_144, %c0_145] : memref<2x1x64xf32, #tpu.memory_space<vmem>>, vector<1x1x64xf32>
    %344 = vector.shape_cast %343 : vector<1x1x64xf32> to vector<1x64xf32>
    %345 = vector.broadcast %344 : vector<1x64xf32> to vector<8x64xf32>
    %346 = arith.addf %342, %345 : vector<8x64xf32>
    %cst_146 = arith.constant 5.000000e-01 : f32
    %347 = vector.broadcast %cst_146 : f32 to vector<8x64xf32>
    %348 = arith.mulf %347, %346 : vector<8x64xf32>
    %cst_147 = arith.constant 4.471500e-02 : f32
    %349 = vector.broadcast %cst_147 : f32 to vector<8x64xf32>
    %350 = arith.mulf %349, %346 : vector<8x64xf32>
    %351 = arith.mulf %350, %346 : vector<8x64xf32>
    %352 = arith.mulf %351, %346 : vector<8x64xf32>
    %353 = arith.addf %346, %352 : vector<8x64xf32>
    %cst_148 = arith.constant 0.797884583 : f32
    %354 = vector.broadcast %cst_148 : f32 to vector<8x64xf32>
    %355 = arith.mulf %354, %353 : vector<8x64xf32>
    %356 = math.tanh %355 : vector<8x64xf32>
    %cst_149 = arith.constant 1.000000e+00 : f32
    %357 = vector.broadcast %cst_149 : f32 to vector<8x64xf32>
    %358 = arith.addf %357, %356 : vector<8x64xf32>
    %359 = arith.mulf %348, %358 : vector<8x64xf32>
    %c1_150 = arith.constant 1 : index
    %c0_151 = arith.constant 0 : index
    %c0_152 = arith.constant 0 : index
    %360 = vector.load %arg13[%c1_150, %c0_151, %c0_152] : memref<2x64x32xf32, #tpu.memory_space<vmem>>, vector<1x64x32xf32>
    %361 = vector.shape_cast %360 : vector<1x64x32xf32> to vector<64x32xf32>
    %cst_153 = arith.constant dense<0.000000e+00> : vector<8x32xf32>
    %362 = tpu.matmul %359, %361, %cst_153 {dimension_numbers = #tpu.dot_dimension_numbers<[1], [0], [0], [1], [0, 0, 1, 1], [], []>} : vector<8x64xf32>, vector<64x32xf32>, vector<8x32xf32> -> vector<8x32xf32>
    %c1_154 = arith.constant 1 : index
    %c0_155 = arith.constant 0 : index
    %c0_156 = arith.constant 0 : index
    %363 = vector.load %arg14[%c1_154, %c0_155, %c0_156] : memref<2x1x32xf32, #tpu.memory_space<vmem>>, vector<1x1x32xf32>
    %364 = vector.shape_cast %363 : vector<1x1x32xf32> to vector<1x32xf32>
    %365 = vector.broadcast %364 : vector<1x32xf32> to vector<8x32xf32>
    %366 = arith.addf %362, %365 : vector<8x32xf32>
    %367 = arith.addf %366, %339 : vector<8x32xf32>
    %c1_157 = arith.constant 1 : index
    %c0_158 = arith.constant 0 : index
    %c0_159 = arith.constant 0 : index
    %368 = vector.load %arg15[%c1_157, %c0_158, %c0_159] : memref<2x1x32xf32, #tpu.memory_space<vmem>>, vector<1x1x32xf32>
    %369 = vector.shape_cast %368 : vector<1x1x32xf32> to vector<1x32xf32>
    %c1_160 = arith.constant 1 : index
    %c0_161 = arith.constant 0 : index
    %c0_162 = arith.constant 0 : index
    %370 = vector.load %arg16[%c1_160, %c0_161, %c0_162] : memref<2x1x32xf32, #tpu.memory_space<vmem>>, vector<1x1x32xf32>
    %371 = vector.shape_cast %370 : vector<1x1x32xf32> to vector<1x32xf32>
    %cst_163 = arith.constant dense<0.000000e+00> : vector<8xf32>
    %372 = vector.multi_reduction <add>, %367, %cst_163 [1] : vector<8x32xf32> to vector<8xf32>
    %373 = vector.shape_cast %372 : vector<8xf32> to vector<8x1xf32>
    %cst_164 = arith.constant 3.200000e+01 : f32
    %374 = vector.broadcast %cst_164 : f32 to vector<8x1xf32>
    %375 = arith.divf %373, %374 : vector<8x1xf32>
    %376 = vector.broadcast %375 : vector<8x1xf32> to vector<8x32xf32>
    %377 = arith.subf %367, %376 : vector<8x32xf32>
    %378 = arith.mulf %377, %377 : vector<8x32xf32>
    %cst_165 = arith.constant dense<0.000000e+00> : vector<8xf32>
    %379 = vector.multi_reduction <add>, %378, %cst_165 [1] : vector<8x32xf32> to vector<8xf32>
    %380 = vector.shape_cast %379 : vector<8xf32> to vector<8x1xf32>
    %cst_166 = arith.constant 3.200000e+01 : f32
    %381 = vector.broadcast %cst_166 : f32 to vector<8x1xf32>
    %382 = arith.divf %380, %381 : vector<8x1xf32>
    %383 = vector.broadcast %375 : vector<8x1xf32> to vector<8x32xf32>
    %384 = arith.subf %367, %383 : vector<8x32xf32>
    %cst_167 = arith.constant 9.99999996E-13 : f32
    %385 = vector.broadcast %cst_167 : f32 to vector<8x1xf32>
    %386 = arith.addf %382, %385 : vector<8x1xf32>
    %387 = math.rsqrt %386 : vector<8x1xf32>
    %388 = vector.broadcast %387 : vector<8x1xf32> to vector<8x32xf32>
    %389 = arith.mulf %384, %388 : vector<8x32xf32>
    %390 = vector.broadcast %369 : vector<1x32xf32> to vector<8x32xf32>
    %391 = arith.mulf %389, %390 : vector<8x32xf32>
    %392 = vector.broadcast %371 : vector<1x32xf32> to vector<8x32xf32>
    %393 = arith.addf %391, %392 : vector<8x32xf32>
    %394 = vector.extract_strided_slice %393 {offsets = [0, 0], sizes = [1, 32], strides = [1, 1]} : vector<8x32xf32> to vector<1x32xf32>
    %c0_168 = arith.constant 0 : index
    %c0_169 = arith.constant 0 : index
    %c0_170 = arith.constant 0 : index
    %395 = vector.load %arg18[%c0_168, %c0_169, %c0_170] : memref<1x1x32xf32, #tpu.memory_space<vmem>>, vector<1x1x32xf32>
    %396 = vector.shape_cast %395 : vector<1x1x32xf32> to vector<1x32xf32>
    %397 = vector.shape_cast %394 : vector<1x32xf32> to vector<1x1x32xf32>
    tpu.vector_store %arg18[%c0_168, %c0_169, %c0_170], %397 {strides = array<i32>} : memref<1x1x32xf32, #tpu.memory_space<vmem>>, vector<1x1x32xf32>,
    %c0_171 = arith.constant 0 : index
    %c0_172 = arith.constant 0 : index
    %c0_173 = arith.constant 0 : index
    %398 = vector.load %arg17[%c0_171, %c0_172, %c0_173] : memref<1x3x8xf32, #tpu.memory_space<vmem>>, vector<1x3x8xf32>
    %399 = vector.shape_cast %398 : vector<1x3x8xf32> to vector<3x8xf32>
    %cst_174 = arith.constant dense<0.000000e+00> : vector<3x32xf32>
    %400 = tpu.matmul %399, %393, %cst_174 {dimension_numbers = #tpu.dot_dimension_numbers<[1], [0], [0], [1], [0, 0, 1, 1], [], []>} : vector<3x8xf32>, vector<8x32xf32>, vector<3x32xf32> -> vector<3x32xf32>
    %c0_175 = arith.constant 0 : index
    %c0_176 = arith.constant 0 : index
    %c0_177 = arith.constant 0 : index
    %401 = vector.load %arg19[%c0_175, %c0_176, %c0_177] : memref<1x3x32xf32, #tpu.memory_space<vmem>>, vector<1x3x32xf32>
    %402 = vector.shape_cast %401 : vector<1x3x32xf32> to vector<3x32xf32>
    %403 = vector.shape_cast %400 : vector<3x32xf32> to vector<1x3x32xf32>
    tpu.vector_store %arg19[%c0_175, %c0_176, %c0_177], %403 {strides = array<i32>} : memref<1x3x32xf32, #tpu.memory_space<vmem>>, vector<1x3x32xf32>,
    return
  }
  func.func @transform_0(%arg0: i32) -> (i32, i32, i32) {
    %c0_i32 = arith.constant 0 : i32
    %c0_i32_0 = arith.constant 0 : i32
    %c0_i32_1 = arith.constant 0 : i32
    return %arg0, %c0_i32, %c0_i32_0 : i32, i32, i32
  }
  func.func @transform_1(%arg0: i32) -> (i32, i32, i32) {
    %c0_i32 = arith.constant 0 : i32
    %c0_i32_0 = arith.constant 0 : i32
    %c0_i32_1 = arith.constant 0 : i32
    return %arg0, %c0_i32, %c0_i32_0 : i32, i32, i32
  }
  func.func @transform_2(%arg0: i32) -> (i32, i32) {
    %c0_i32 = arith.constant 0 : i32
    %c0_i32_0 = arith.constant 0 : i32
    %c0_i32_1 = arith.constant 0 : i32
    return %c0_i32, %c0_i32_0 : i32, i32
  }
  func.func @transform_3(%arg0: i32) -> (i32, i32) {
    %c0_i32 = arith.constant 0 : i32
    %c0_i32_0 = arith.constant 0 : i32
    %c0_i32_1 = arith.constant 0 : i32
    return %c0_i32, %c0_i32_0 : i32, i32
  }
  func.func @transform_4(%arg0: i32) -> (i32, i32, i32) {
    %c0_i32 = arith.constant 0 : i32
    %c0_i32_0 = arith.constant 0 : i32
    %c0_i32_1 = arith.constant 0 : i32
    %c0_i32_2 = arith.constant 0 : i32
    return %c0_i32, %c0_i32_0, %c0_i32_1 : i32, i32, i32
  }
  func.func @transform_5(%arg0: i32) -> (i32, i32, i32) {
    %c0_i32 = arith.constant 0 : i32
    %c0_i32_0 = arith.constant 0 : i32
    %c0_i32_1 = arith.constant 0 : i32
    %c0_i32_2 = arith.constant 0 : i32
    return %c0_i32, %c0_i32_0, %c0_i32_1 : i32, i32, i32
  }
  func.func @transform_6(%arg0: i32) -> (i32, i32, i32) {
    %c0_i32 = arith.constant 0 : i32
    %c0_i32_0 = arith.constant 0 : i32
    %c0_i32_1 = arith.constant 0 : i32
    %c0_i32_2 = arith.constant 0 : i32
    return %c0_i32, %c0_i32_0, %c0_i32_1 : i32, i32, i32
  }
  func.func @transform_7(%arg0: i32) -> (i32, i32, i32) {
    %c0_i32 = arith.constant 0 : i32
    %c0_i32_0 = arith.constant 0 : i32
    %c0_i32_1 = arith.constant 0 : i32
    %c0_i32_2 = arith.constant 0 : i32
    return %c0_i32, %c0_i32_0, %c0_i32_1 : i32, i32, i32
  }
  func.func @transform_8(%arg0: i32) -> (i32, i32, i32) {
    %c0_i32 = arith.constant 0 : i32
    %c0_i32_0 = arith.constant 0 : i32
    %c0_i32_1 = arith.constant 0 : i32
    %c0_i32_2 = arith.constant 0 : i32
    return %c0_i32, %c0_i32_0, %c0_i32_1 : i32, i32, i32
  }
  func.func @transform_9(%arg0: i32) -> (i32, i32, i32) {
    %c0_i32 = arith.constant 0 : i32
    %c0_i32_0 = arith.constant 0 : i32
    %c0_i32_1 = arith.constant 0 : i32
    %c0_i32_2 = arith.constant 0 : i32
    return %c0_i32, %c0_i32_0, %c0_i32_1 : i32, i32, i32
  }
  func.func @transform_10(%arg0: i32) -> (i32, i32, i32) {
    %c0_i32 = arith.constant 0 : i32
    %c0_i32_0 = arith.constant 0 : i32
    %c0_i32_1 = arith.constant 0 : i32
    %c0_i32_2 = arith.constant 0 : i32
    return %c0_i32, %c0_i32_0, %c0_i32_1 : i32, i32, i32
  }
  func.func @transform_11(%arg0: i32) -> (i32, i32, i32) {
    %c0_i32 = arith.constant 0 : i32
    %c0_i32_0 = arith.constant 0 : i32
    %c0_i32_1 = arith.constant 0 : i32
    %c0_i32_2 = arith.constant 0 : i32
    return %c0_i32, %c0_i32_0, %c0_i32_1 : i32, i32, i32
  }
  func.func @transform_12(%arg0: i32) -> (i32, i32, i32) {
    %c0_i32 = arith.constant 0 : i32
    %c0_i32_0 = arith.constant 0 : i32
    %c0_i32_1 = arith.constant 0 : i32
    %c0_i32_2 = arith.constant 0 : i32
    return %c0_i32, %c0_i32_0, %c0_i32_1 : i32, i32, i32
  }
  func.func @transform_13(%arg0: i32) -> (i32, i32, i32) {
    %c0_i32 = arith.constant 0 : i32
    %c0_i32_0 = arith.constant 0 : i32
    %c0_i32_1 = arith.constant 0 : i32
    %c0_i32_2 = arith.constant 0 : i32
    return %c0_i32, %c0_i32_0, %c0_i32_1 : i32, i32, i32
  }
  func.func @transform_14(%arg0: i32) -> (i32, i32, i32) {
    %c0_i32 = arith.constant 0 : i32
    %c0_i32_0 = arith.constant 0 : i32
    %c0_i32_1 = arith.constant 0 : i32
    %c0_i32_2 = arith.constant 0 : i32
    return %c0_i32, %c0_i32_0, %c0_i32_1 : i32, i32, i32
  }
  func.func @transform_15(%arg0: i32) -> (i32, i32, i32) {
    %c0_i32 = arith.constant 0 : i32
    %c0_i32_0 = arith.constant 0 : i32
    %c0_i32_1 = arith.constant 0 : i32
    %c0_i32_2 = arith.constant 0 : i32
    return %c0_i32, %c0_i32_0, %c0_i32_1 : i32, i32, i32
  }
  func.func @transform_16(%arg0: i32) -> (i32, i32, i32) {
    %c0_i32 = arith.constant 0 : i32
    %c0_i32_0 = arith.constant 0 : i32
    %c0_i32_1 = arith.constant 0 : i32
    return %arg0, %c0_i32, %c0_i32_0 : i32, i32, i32
  }
  func.func @transform_17(%arg0: i32) -> (i32, i32, i32) {
    %c0_i32 = arith.constant 0 : i32
    %c0_i32_0 = arith.constant 0 : i32
    %c0_i32_1 = arith.constant 0 : i32
    return %arg0, %c0_i32, %c0_i32_0 : i32, i32, i32
  }
  func.func @transform_18(%arg0: i32) -> (i32, i32, i32) {
    %c0_i32 = arith.constant 0 : i32
    %c0_i32_0 = arith.constant 0 : i32
    %c0_i32_1 = arith.constant 0 : i32
    return %arg0, %c0_i32, %c0_i32_0 : i32, i32, i32
  }
}

</mosaic_0001>

<bundles_post_ra>
// kernel: dual_cl_forward.1
= control target key start
LH: loop header
LB: loop body
LE: loop exit
PB: predicated region body
PF: predicated region fallthrough
CT: control target
= control target key end

     0   :  { %s4777_s0 = inlined_call_operand.vmem [shape: f32[2,8,32], index: 0, kind: input, shape index: {}]   ;;  %s4778_s1 = inlined_call_operand.vmem [shape: f32[2,1,8], index: 1, kind: input, shape index: {}]   ;;  %s4779_s2 = inlined_call_operand.vmem [shape: f32[1,32], index: 2, kind: input, shape index: {}]   ;;  %s4780_s3 = inlined_call_operand.vmem [shape: f32[1,32], index: 3, kind: input, shape index: {}]   ;;  %s4781_s4 = inlined_call_operand.hbm [shape: f32[2,32,96], index: 4, kind: input, shape index: {}]   ;;  %s4782_s5 = inlined_call_operand.vmem [shape: f32[2,1,96], index: 5, kind: input, shape index: {}]   ;;  %s4783_s6 = inlined_call_operand.vmem [shape: f32[2,32,32], index: 6, kind: input, shape index: {}]   ;;  %s4784_s7 = inlined_call_operand.vmem [shape: f32[2,1,32], index: 7, kind: input, shape index: {}, may-alias: {7,9,13,15}]   ;;  %s4785_s8 = inlined_call_operand.vmem [shape: f32[2,1,32], index: 8, kind: input, shape index: {}, may-alias: {8,14}]   ;;  %s4786_s9 = inlined_call_operand.vmem [shape: f32[2,1,32], index: 9, kind: input, shape index: {}, may-alias: {7,9,13,15}]   ;;  %s4787_s10 = inlined_call_operand.vmem [shape: f32[2,32,64], index: 10, kind: input, shape index: {}]   ;;  %s4788_s11 = inlined_call_operand.vmem [shape: f32[2,1,64], index: 11, kind: input, shape index: {}]   ;;  %s4789_s12 = inlined_call_operand.vmem [shape: f32[2,64,32], index: 12, kind: input, shape index: {}]   ;;  %s4790_s13 = inlined_call_operand.vmem [shape: f32[2,1,32], index: 13, kind: input, shape index: {}, may-alias: {7,9,13,15}]   ;;  %s4791_s14 = inlined_call_operand.vmem [shape: f32[2,1,32], index: 14, kind: input, shape index: {}, may-alias: {8,14}]   ;;  %s4792_s15 = inlined_call_operand.vmem [shape: f32[2,1,32], index: 15, kind: input, shape index: {}, may-alias: {7,9,13,15}]   ;;  %s4793_s16 = inlined_call_operand.vmem [shape: f32[2,3,8], index: 16, kind: input, shape index: {}]   ;;  %s4794_s17 = inlined_call_operand.hbm [shape: f32[2,1,32], index: 17, kind: output, shape index: {0}]   ;;  %s4795_s18 = inlined_call_operand.vmem [shape: f32[2,3,32], index: 18, kind: output, shape index: {1}]  }
   0x1   :  { %4815 = sst [smem:[#allocation13_spill]] %s4777_s0 }
   0x2   :  { %4816 = sst [smem:[#allocation14_spill]] %s4778_s1 }
   0x3   :  { %4817 = sst [smem:[#allocation15_spill]] %s4779_s2 }
   0x4   :  { %4818 = sst [smem:[#allocation16_spill]] %s4780_s3 }
   0x5   :  { %4819 = sst [smem:[#allocation17_spill]] %s4781_s4 }
   0x6   :  { %24 = vsyncpa [#allocation3], 0 }
   0x7   :  { %25 = vsyncpa [#allocation4], 0 }
   0x8   :  { %27 = vsyncpa [#allocation4 + $0x1], 0  ;;  %s4244_s27 = smov 0   ;;  %s4246_s28 = smov 0  }
   0x9   :  { %s4248_s29 = smov 0   ;;  %s4250_s30 = smov 0  }
   0xa LB: > { %4820 = sst [smem:[#allocation8_spill]] %s4117_s27  ;;  %s4265_s0 = sadd.s32 4294967295, %s4129_s30   ;;  %s4129_s30 = sphi %s4250_s30, %s4852_s30   ;;  %s4125_s29 = sphi %s4248_s29, %s4854_s29   ;;  %s4121_s28 = sphi %s4246_s28, %s4856_s28   ;;  %s4117_s27 = sphi %s4244_s27, %s4855_s27  }
   0xb   : > { %4821 = sst [smem:[#allocation9_spill]] %s4125_s29  ;;  %s3486_s19 = sadd.s32 4294967294, %s4129_s30  }
   0xc   : > { %s4269_s1 = sadd.s32 1, %s4129_s30   ;;  %s412_s20 = sadd.s32 1, %s4125_s29 }
   0xd   : > { %4822 = sst [smem:[#allocation10_spill]] %s4269_s1  ;;  %s409_s21 = ssub.s32 %s4129_s30, %s4269_s1 }
   0xe   : > { %p422_p0 = scmp.ne.s32.totalorder %s4125_s29, %s4121_s28  ;;  %p410_p1 = scmp.eq.s32.totalorder %s409_s21, 0 }
   0xf   : > { %p423_p2 = scmp.eq.s32.totalorder %s4265_s0, 1  ;;  %p428_p3 = scmp.ne.s32.totalorder %s4121_s28, %s4117_s27 }
  0x10   : > { %p429_p4 = scmp.eq.s32.totalorder %s3486_s19, 1  ;;  %p3487_p7 = scmp.ge.s32.totalorder %s4129_s30, 1 }
  0x11   : > { %s4280_s22 = scalar_select %p410_p1, %s4125_s29, %s412_s20  }
  0x12   : > { %p4282_p5 = por %p423_p2, %p422_p0  ;;  %p4286_p6 = por %p429_p4, %p428_p3 }
  0x13   : > { %4823 = sst [smem:[#allocation11_spill]] %s4280_s22  ;;  %p462_p8 = scmp.lt.s32.totalorder %s4129_s30, 3 }
  0x14   : > { %s4824_s2 = scalar_select %p4282_p5, 1, 0 }
  0x15   : > { %s4825_s23 = scalar_select %p4286_p6, 1, 0 }
  0x16   : > { %p4801_p9 = scmp.eq.s32.totalorder %s4265_s0, 0  ;;  %p4293_p10 = pnand %p3487_p7, %p462_p8 }
  0x17   : > { %4826 = sst [smem:[#allocation12_spill]] %s4825_s23  ;;  %s4131_s25 = smov [#allocation2]  }
  0x18   : > { %s4827_s24 = scalar_select %p4293_p10, 1, 0 }
  0x19   : > { %s480_s26 = sshll.u32 %s4131_s25, 4  ;;  %p3929_p11 = pneg %p4293_p10  ;;  %s481_s26 = int_to_ptr.vmem [resolvable:$true] %s480_s26 }
  0x1a   : > { %s4829_s4 = sld [smem:[#allocation17_spill]] }
  0x1b   : > { %p4301_p12 = pnand %p4801_p9, %p3929_p11 }
  0x1d   : > { %p4037_p0 = pneg %p4301_p12 }
  0x20   : > { %s4035_s22 = scalar_lea.hbm %s4829_s4, 1024 }
  0x21   : > { %p4036_p13 = scmp.ne.s32.totalorder %s4829_s4, %s4035_s22  ;;  %p4042_p3 = scmp.lt.u32.totalorder %s4035_s22, %s4829_s4 }
  0x23   : > { %p4038_p1 = pnand %p4037_p0, %p4036_p13 }
  0x25   : > { %p4039_p2 = pneg %p4038_p1 }
  0x27   : > { %p4044_p4 = pnand %p4042_p3, %p4039_p2 }
  0x29   : > { %4047 = shalt.err (!%p4044_p4)
}
  0x2a   : > { %s4048_s27 = scalar_lea.vmem %s481_s26, 1024  ;;  %p4056_p9 = scmp.lt.s32.totalorder %s481_s26, %s481_s26 }
  0x2b   : > { %p4049_p7 = scmp.ne.s32.totalorder %s481_s26, %s4048_s27  ;;  %p4057_p6 = scmp.lt.s32.totalorder %s4048_s27, %s4048_s27 }
  0x2d   : > { %p4051_p8 = pnand %p4049_p7, %p4037_p0  ;;  %p4058_p5 = por %p4057_p6, %p4056_p9 }
  0x2f   : > { %p4052_p11 = pneg %p4051_p8 }
  0x31   : > { %p4059_p10 = pnand %p4058_p5, %p4052_p11 }
  0x33   : > { %4062 = shalt.err (!%p4059_p10)
}
  0x34   : > { %s4132_s29 = smov 128   ;;  %s4133_s1 = smov 8  }
  0x35   : > { %3932 = dma.hbm_to_vmem [thread:$0]  (!%p4301_p12), %s4829_s4, 1024, %s481_s26, [#allocation3], %s4132_s29, %s4132_s29, %s4133_s1  }
  0x36   : > { %p4830_p13 = scmp.ne.s32.totalorder %s4827_s24, 0 }
  0x37   : > { %p4831_p1 = scmp.eq.s32.totalorder (!%p4830_p13), %s4265_s0, 0 }
  0x38   : > { %549 = sbr.rel (%p4830_p13) target bundleno = 7913 (0x1ee9), region = 88 }
  0x3f   : > { %4108 = dma.done.wait (%p4831_p1), [#allocation3], 1024   ;;  %p4832_p0 = pmov %p4831_p1 }
  0x40   : > { %p612_p5 = scmp.lt.s32.totalorder %s4265_s0, 1  ;;  %s4833_s25 = sld [smem:[#allocation13_spill]]  ;;  %vm631_vm0 = vcmask 261120   ;;  %v660_v7 = vld [vmem:[#allocation2] sm:$0xff]  ;;  %v661_v8 = vld [vmem:[#allocation2 + $0x8] sm:$0xff]  ;;  %v662_v9 = vld [vmem:[#allocation2 + $0x10] sm:$0xff] }
  0x41   : > { %4110 = vsyncadd (%p4832_p0), [#allocation3], 4294966272  ;;  %v4134_v10 = vmov 0.0|0.0   ;;  %v3876_v11 = vpack.c.bf16 %v661_v8, %v660_v7  ;;  %v663_v12 = vld [vmem:[#allocation2 + $0x18] sm:$0xff]  ;;  %vm4135_vm1 = vmmov 0   ;;  %v4136_v13 = vmov 0.0  }
  0x42   : > { %s4329_s27 = scalar_select %p612_p5, %s4265_s0, 1  ;;  %3875 = vmatprep.subr.bf16.mxu0 %v4134_v10  ;;  %3676 = vmatprep.mubr.msk.f32.mxu0 %vm4135_vm1, %v4136_v13  ;;  %v3879_v14 = vpack.c.bf16 %v663_v12, %v662_v9  ;;  %v3497_v24 = vld [vmem:[%s4782_s5] ss:$0 sm:$0xff]  ;;  %vm751_vm2 = vcmask 64512   ;;  %v745_v52 = vld [vmem:[%s4783_s6 + $0x8] sm:$0xff]  ;;  %vm1862_vm3 = vcmask 523264  }
  0x43   : > { %3679 = vmatprep.subr.mxu1 %v4136_v13  ;;  %3681 = vmatprep.mubr.msk.f32.mxu1 %vm4135_vm1, %v4136_v13  ;;  %s4834_s1 = sld [smem:[#allocation15_spill]]  ;;  %s4835_s3 = sld [smem:[#allocation16_spill]]  ;;  %v744_v61 = vld [vmem:[%s4783_s6] sm:$0xff]  ;;  %vm3276_vm4 = vcmask 253952  }
  0x44   : > { %s3492_s22 = sshll.u32 %s4329_s27, 3  ;;  %3877 = vmatpush3.bf16.msra.mxu0 %v3876_v11  ;;  %s4812_s19 = smov 120  }
  0x45   : > { %3878 = vmatprep.subr.bf16.mxu0 %v4134_v10  ;;  %s4811_s21 = smov 56   ;;  %s4810_s23 = smov 80  }
  0x46   : > { %s615_s26 = scalar_lea.vmem %s4833_s25, %s3492_s22  ;;  %s4813_s25 = smov 96  }
  0x47   : > { %v627_v0 = vld [vmem:[%s615_s26] sm:$0xff]  ;;  %s4139_s26 = smov 88   ;;  %s4809_s22 = smov 64  }
  0x48   : > { %v632_v1 = vsel %vm631_vm0, %v627_v0, 0.0  ;;  %3880 = vmatpush3.bf16.msra.mxu0 %v3879_v14  ;;  %s4808_s24 = smov 112   ;;  %s4806_s29 = smov 72  }
  0x49   : > { %633 = vadd.xlane.f32.xlu0 %v632_v1  ;;  %3689 = vmatprep.subr.mxu0 %v4136_v13  ;;  %v3495_v19 = vld [vmem:[%s4834_s1] ss:$0 sm:$0xff]  ;;  %s4836_s1 = sld [smem:[#allocation14_spill]]  ;;  %p4847_p9 = scmp.ne.s32.totalorder %s4824_s2, 0 }
  0x4a   : > { %v3496_v21 = vld [vmem:[%s4835_s3] ss:$0 sm:$0xff] }
  0x4f   : > { %s618_s20 = scalar_lea.vmem %s4836_s1, %s4329_s27  ;;  %s4804_s1 = smov 48  }
  0x50   : > { %v4383_v31 = vld [vmem:[%s618_s20] ss:$0 sm:$0xff]  ;;  %s4805_s20 = smov 104  }
  0xd6   : > { %v634_v2 = vpop.xlane.xlu0 %633 }
  0xd7   : > { %v636_v3 = vmul.f32 0.03125, %v634_v2 }
  0xd9   : > { %v637_v4 = vsub.f32 %v627_v0, %v636_v3 }
  0xdb   : > { %v638_v5 = vmul.f32 %v637_v4, %v637_v4 }
  0xdd   : > { %v639_v6 = vsel %vm631_vm0, %v638_v5, 0.0 }
  0xde   : > { %640 = vadd.xlane.f32.xlu0 %v639_v6 }
 0x16b   : > { %v641_v15 = vpop.xlane.xlu0 %640 }
 0x16c   : > { %v642_v16 = vmul.f32 0.03125, %v641_v15 }
 0x16e   : > { %v643_v17 = vadd.f32 1e-12, %v642_v16 }
 0x170   : > { %3989 = vrsqrt.f32 %v643_v17 }
 0x17a   : > { %v3990_v18 = vpop.eup %3989 }
 0x17b   : > { %v645_v20 = vmul.f32 %v3990_v18, %v637_v4 }
 0x17d   : > { %v652_v22 = vmul.f32 %v3495_v19, %v645_v20 }
 0x17f   : > { %v4351_v23 = vadd.f32 %v3496_v21, %v652_v22 }
 0x181   : > { %3677 = vmatmul.mubr.msk.f32.vlgmr.msra.gmra.mrb[0].mxu0 %vm631_vm0, %v4351_v23 }
 0x182   : > { %3691 = vmatprep.mubr.msk.f32.mxu0 %vm4135_vm1, %v4136_v13 }
 0x254   : > { %v740_v25 = vpop.f32.mrb[0].mxu0 }
 0x255   : > { %v4360_v26 = vadd.f32 %v3497_v24, %v740_v25  ;;  %v3678_v27 = vpop.f32.mrb[1].mxu0 }
 0x257   : > { %921 = vrot.lane.b32.xlu0 %v4360_v26, %s4812_s19  ;;  %749 = vrot.lane.b32.xlu1 %v4360_v26, %s4813_s25  ;;  %s4838_s19 = smov 120  }
 0x25b   : > { %923 = vrot.lane.b32.xlu1 %v4360_v26, %s4139_s26 }
 0x2c9   : > { %v750_v28 = vpop.permute.xlu1 %749  ;;  %v922_v30 = vpop.permute.xlu0 %921 }
 0x2ca   : > { %3680 = vmatpush3.xpose.msk.msra.mxu1 %vm751_vm2, %v750_v28 }
 0x2cb   : > { %3684 = vmatprep.subr.mxu1 %v4136_v13 }
 0x2cd   : > { %3682 = vmatmul.mubr.msk.f32.vlgmr.msra.gmra.mrb[0].mxu1 %vm751_vm2, %v4360_v26  ;;  %v924_v29 = vpop.permute.xlu1 %923 }
 0x2ce   : > { %3690 = vmatpush3.xpose.msk.msra.mxu0 %vm751_vm2, %v924_v29  ;;  %3686 = vmatprep.mubr.msk.f32.mxu1 %vm4135_vm1, %v4136_v13  ;;  %v746_v29 = vld [vmem:[%s4783_s6 + $0x10] sm:$0xff] }
 0x2cf   : > { %3699 = vmatprep.subr.mxu0 %v4136_v13 }
 0x2d1   : > { %3692 = vmatmul.mubr.msk.f32.vlgmr.msra.gmra.mrb[2].mxu0 %vm751_vm2, %v922_v30 }
 0x2d2   : > { %3701 = vmatprep.mubr.msk.f32.mxu0 %vm4135_vm1, %v4136_v13  ;;  %3700 = vmatpush3.msra.mxu0 %v745_v52 }
 0x2d3   : > { %3709 = vmatprep.subr.mxu0 %v4136_v13 }
 0x3a0   : > { %v822_v32 = vpop.f32.mrb[0].mxu1 }
 0x3a1   : > { %v826_v33 = vmul.f32 0.35355338, %v822_v32  ;;  %v3683_v34 = vpop.f32.mrb[1].mxu1 }
 0x3a3   : > { %v833_v35 = vadd.f32 %v4383_v31, %v826_v33 }
 0x3a4   : > { %v995_v36 = vpop.f32.mrb[2].mxu0 }
 0x3a5   : > { %v999_v37 = vmul.f32 0.35355338, %v995_v36  ;;  %v3693_v38 = vpop.f32.mrb[3].mxu0  ;;  %v834_v39 = vsel %vm751_vm2, %v833_v35, -inf }
 0x3a6   : > { %835 = vmax.xlane.f32.xlu1 %v834_v39 }
 0x3a7   : > { %v1000_v40 = vadd.f32 %v4383_v31, %v999_v37 }
 0x3a9   : > { %v1001_v41 = vsel %vm751_vm2, %v1000_v40, -inf }
 0x3aa   : > { %1002 = vmax.xlane.f32.xlu0 %v1001_v41 }
 0x3c0   : > { %1012 = vrot.lane.b32.xlu0 %v4360_v26, %s4811_s21  ;;  %s4840_s21 = smov 80  }
 0x433   : > { %v836_v42 = vpop.xlane.xlu1 %835 }
 0x434   : > { %v837_v43 = vsub.f32 %v833_v35, %v836_v42 }
 0x436   : > { %v838_v44 = vmul.f32 1.442695, %v837_v43 }
 0x437   : > { %v1003_v45 = vpop.xlane.xlu0 %1002 }
 0x438   : > { %3991 = vpow2.f32 %v838_v44  ;;  %v1004_v46 = vsub.f32 %v1000_v40, %v1003_v45 }
 0x43a   : > { %v1005_v47 = vmul.f32 1.442695, %v1004_v46 }
 0x43b   : > { %v1013_v58 = vpop.permute.xlu0 %1012 }
 0x43c   : > { %3993 = vpow2.f32 %v1005_v47 }
 0x442   : > { %v3992_v48 = vpop.eup %3991 }
 0x443   : > { %v840_v49 = vsel %vm751_vm2, %v3992_v48, 0.0 }
 0x444   : > { %841 = vadd.xlane.f32.xlu1 %v840_v49 }
 0x446   : > { %v3994_v50 = vpop.eup %3993 }
 0x447   : > { %v1007_v51 = vsel %vm751_vm2, %v3994_v50, 0.0 }
 0x448   : > { %1008 = vadd.xlane.f32.xlu1 %v1007_v51 }
 0x459   : > { %845 = vrot.lane.b32.xlu1 %v4360_v26, %s4809_s22 }
 0x45d   : > { %1236 = vrot.lane.b32.xlu1 %v4360_v26, %s4810_s23  ;;  %s4837_s23 = smov 96  }
 0x461   : > { %1234 = vrot.lane.b32.xlu1 %v4360_v26, %s4808_s24  ;;  %s4841_s24 = smov 64  }
 0x4d1   : > { %v842_v53 = vpop.xlane.xlu1 %841 }
 0x4d2   : > { %3995 = vrcp.f32 %v842_v53  ;;  %v3516_v53 = vld [vmem:[%s4784_s7] ss:$0 sm:$0xff] }
 0x4d5   : > { %v1009_v54 = vpop.xlane.xlu1 %1008 }
 0x4d6   : > { %3997 = vrcp.f32 %v1009_v54 }
 0x4d9   : > { %v846_v55 = vpop.permute.xlu1 %845 }
 0x4da   : > { %3685 = vmatpush3.msra.mxu1 %v846_v55 }
 0x4db   : > { %3694 = vmatprep.subr.mxu1 %v4136_v13 }
 0x4dc   : > { %v3996_v56 = vpop.eup %3995 }
 0x4dd   : > { %v844_v57 = vmul.f32 %v3996_v56, %v3992_v48  ;;  %v1237_v0 = vpop.permute.xlu1 %1236 }
 0x4df   : > { %3687 = vmatmul.mubr.msk.f32.vlgmr.msra.gmra.mrb[2].mxu1 %vm751_vm2, %v844_v57 }
 0x4e0   : > { %v3998_v59 = vpop.eup %3997  ;;  %3695 = vmatpush3.msra.mxu1 %v1013_v58  ;;  %3696 = vmatprep.mubr.msk.f32.mxu1 %vm4135_vm1, %v4136_v13 }
 0x4e1   : > { %v1011_v60 = vmul.f32 %v3998_v59, %v3994_v50  ;;  %3704 = vmatprep.subr.mxu1 %v4136_v13  ;;  %v1235_v3 = vpop.permute.xlu1 %1234 }
 0x4e3   : > { %3697 = vmatmul.mubr.msk.f32.vlgmr.msra.gmra.mrb[4].mxu1 %vm751_vm2, %v1011_v60 }
 0x4e4   : > { %3706 = vmatprep.mubr.msk.f32.mxu1 %vm4135_vm1, %v4136_v13  ;;  %3705 = vmatpush3.msra.mxu1 %v744_v61 }
 0x4e5   : > { %3714 = vmatprep.subr.mxu1 %v4136_v13 }
 0x5b2   : > { %v917_v62 = vpop.f32.mrb[2].mxu1 }
 0x5b3   : > { %v3688_v63 = vpop.f32.mrb[3].mxu1  ;;  %3707 = vmatmul.mubr.msk.f32.vlgmr.msra.gmra.mrb[6].mxu1 %vm751_vm2, %v917_v62 }
 0x5b4   : > { %3716 = vmatprep.mubr.msk.f32.mxu1 %vm4135_vm1, %v4136_v13 }
 0x5b6   : > { %v1084_v1 = vpop.f32.mrb[4].mxu1 }
 0x5b7   : > { %v3698_v2 = vpop.f32.mrb[5].mxu1  ;;  %3702 = vmatmul.mubr.msk.f32.vlgmr.msra.gmra.mrb[4].mxu0 %vm751_vm2, %v1084_v1  ;;  %v1755_v1 = vld [vmem:[%s4787_s10 + $0x8] sm:$0xff] }
 0x5b8   : > { %3710 = vmatpush3.xpose.msk.msra.mxu0 %vm751_vm2, %v1237_v0  ;;  %3711 = vmatprep.mubr.msk.f32.mxu0 %vm4135_vm1, %v4136_v13  ;;  %v1754_v0 = vld [vmem:[%s4787_s10] sm:$0xff] }
 0x5b9   : > { %3719 = vmatprep.subr.mxu0 %v4136_v13  ;;  %v3882_v2 = vpack.c.bf16 %v1755_v1, %v1754_v0  ;;  %v3523_v0 = vld [vmem:[%s4791_s14] ss:$0 sm:$0xff] }
 0x5bb   : > { %3712 = vmatmul.mubr.msk.f32.vlgmr.msra.gmra.mrb[6].mxu0 %vm751_vm2, %v1235_v3  ;;  %v1757_v3 = vld [vmem:[%s4787_s10 + $0x18] sm:$0xff] }
 0x5bc   : > { %3721 = vmatprep.mubr.msk.f32.mxu0 %vm4135_vm1, %v4136_v13  ;;  %3720 = vmatpush3.msra.mxu0 %v746_v29 }
 0x5bd   : > { %3729 = vmatprep.subr.mxu0 %v4136_v13 }
 0x686   : > { %v1230_v4 = vpop.f32.mrb[6].mxu1 }
 0x687   : > { %v3708_v5 = vpop.f32.mrb[7].mxu1 }
 0x68a   : > { %v1157_v6 = vpop.f32.mrb[4].mxu0 }
 0x68b   : > { %v1231_v7 = vadd.f32 %v1230_v4, %v1157_v6  ;;  %v3703_v8 = vpop.f32.mrb[5].mxu0 }
 0x68e   : > { %v1308_v9 = vpop.f32.mrb[6].mxu0 }
 0x68f   : > { %v1312_v11 = vmul.f32 0.35355338, %v1308_v9  ;;  %v3713_v12 = vpop.f32.mrb[7].mxu0  ;;  %v3517_v9 = vld [vmem:[%s4785_s8] ss:$0 sm:$0xff] }
 0x690   : > { %v3518_v12 = vld [vmem:[%s4786_s9] ss:$0 sm:$0xff] }
 0x691   : > { %v1313_v14 = vadd.f32 %v4383_v31, %v1312_v11 }
 0x693   : > { %v1314_v15 = vsel %vm751_vm2, %v1313_v14, -inf }
 0x694   : > { %1315 = vmax.xlane.f32.xlu1 %v1314_v15 }
 0x6a5   : > { %1325 = vrot.lane.b32.xlu1 %v4360_v26, %s4804_s1  ;;  %s4807_s1 = smov 40  }
 0x6a9   : > { %1475 = vrot.lane.b32.xlu1 %v4360_v26, %s4805_s20 }
 0x721   : > { %v1316_v16 = vpop.xlane.xlu1 %1315 }
 0x722   : > { %v1317_v17 = vsub.f32 %v1313_v14, %v1316_v16  ;;  %v1847_v16 = vld [vmem:[%s4789_s12] sm:$0xff] }
 0x724   : > { %v1318_v18 = vmul.f32 1.442695, %v1317_v17  ;;  %v1848_v17 = vld [vmem:[%s4789_s12 + $0x8] sm:$0xff] }
 0x725   : > { %v1326_v19 = vpop.permute.xlu1 %1325 }
 0x726   : > { %3999 = vpow2.f32 %v1318_v18  ;;  %3715 = vmatpush3.msra.mxu1 %v1326_v19  ;;  %v3888_v18 = vpack.c.bf16 %v1848_v17, %v1847_v16  ;;  %v1849_v19 = vld [vmem:[%s4789_s12 + $0x10] sm:$0xff] }
 0x727   : > { %3724 = vmatprep.subr.mxu1 %v4136_v13 }
 0x729   : > { %v1476_v28 = vpop.permute.xlu1 %1475 }
 0x730   : > { %v4000_v20 = vpop.eup %3999 }
 0x731   : > { %v1320_v21 = vsel %vm751_vm2, %v4000_v20, 0.0 }
 0x732   : > { %1321 = vadd.xlane.f32.xlu0 %v1320_v21 }
 0x748   : > { %1477 = vrot.lane.b32.xlu0 %v4360_v26, %s4806_s29 }
 0x7bf   : > { %v1322_v22 = vpop.xlane.xlu0 %1321 }
 0x7c0   : > { %4001 = vrcp.f32 %v1322_v22  ;;  %v1851_v22 = vld [vmem:[%s4789_s12 + $0x20] sm:$0xff] }
 0x7c3   : > { %v1478_v27 = vpop.permute.xlu0 %1477 }
 0x7ca   : > { %v4002_v24 = vpop.eup %4001 }
 0x7cb   : > { %v1324_v25 = vmul.f32 %v4002_v24, %v4000_v20  ;;  %v1850_v20 = vld [vmem:[%s4789_s12 + $0x18] sm:$0xff]  ;;  %v1852_v24 = vld [vmem:[%s4789_s12 + $0x28] sm:$0xff] }
 0x7cc   : > { %v3891_v21 = vpack.c.bf16 %v1850_v20, %v1849_v19 }
 0x7cd   : > { %3717 = vmatmul.mubr.msk.f32.vlgmr.msra.gmra.mrb[8].mxu1 %vm751_vm2, %v1324_v25  ;;  %v3894_v25 = vpack.c.bf16 %v1852_v24, %v1851_v22 }
 0x7ce   : > { %3725 = vmatpush3.xpose.msk.msra.mxu1 %vm751_vm2, %v1478_v27  ;;  %3726 = vmatprep.mubr.msk.f32.mxu1 %vm4135_vm1, %v4136_v13  ;;  %v1853_v27 = vld [vmem:[%s4789_s12 + $0x30] sm:$0xff] }
 0x7cf   : > { %3734 = vmatprep.subr.mxu1 %v4136_v13 }
 0x7d1   : > { %3727 = vmatmul.mubr.msk.f32.vlgmr.msra.gmra.mrb[10].mxu1 %vm751_vm2, %v1476_v28  ;;  %v1854_v28 = vld [vmem:[%s4789_s12 + $0x38] sm:$0xff] }
 0x7d2   : > { %3736 = vmatprep.mubr.msk.f32.mxu1 %vm4135_vm1, %v4136_v13  ;;  %v3897_v29 = vpack.c.bf16 %v1854_v28, %v1853_v27 }
 0x8a0   : > { %v1397_v30 = vpop.f32.mrb[8].mxu1 }
 0x8a1   : > { %v3718_v32 = vpop.f32.mrb[9].mxu1  ;;  %3722 = vmatmul.mubr.msk.f32.vlgmr.msra.gmra.mrb[8].mxu0 %vm751_vm2, %v1397_v30  ;;  %v3519_v30 = vld [vmem:[%s4788_s11] ss:$0 sm:$0xff] }
 0x8a2   : > { %3731 = vmatprep.mubr.msk.f32.mxu0 %vm4135_vm1, %v4136_v13 }
 0x8a4   : > { %v1549_v33 = vpop.f32.mrb[10].mxu1 }
 0x8a5   : > { %v1553_v34 = vmul.f32 0.35355338, %v1549_v33  ;;  %v3728_v35 = vpop.f32.mrb[11].mxu1 }
 0x8a7   : > { %v1554_v36 = vadd.f32 %v4383_v31, %v1553_v34 }
 0x8a9   : > { %v1555_v37 = vsel %vm751_vm2, %v1554_v36, -inf }
 0x8aa   : > { %1556 = vmax.xlane.f32.xlu1 %v1555_v37 }
 0x937   : > { %v1557_v38 = vpop.xlane.xlu1 %1556 }
 0x938   : > { %v1558_v39 = vsub.f32 %v1554_v36, %v1557_v38 }
 0x93a   : > { %v1559_v40 = vmul.f32 1.442695, %v1558_v39 }
 0x93c   : > { %4003 = vpow2.f32 %v1559_v40 }
 0x946   : > { %v4004_v41 = vpop.eup %4003 }
 0x947   : > { %v1561_v42 = vsel %vm751_vm2, %v4004_v41, 0.0 }
 0x948   : > { %1562 = vadd.xlane.f32.xlu0 %v1561_v42 }
 0x95e   : > { %1566 = vrot.lane.b32.xlu0 %v4360_v26, %s4807_s1  ;;  %v747_v26 = vld [vmem:[%s4783_s6 + $0x18] sm:$0xff]  ;;  %s4842_s1 = smov 112  }
 0x95f   : > { %3735 = vmatpush3.msra.mxu1 %v747_v26 }
 0x960   : > { %3887 = vmatprep.subr.bf16.mxu1 %v4134_v10 }
 0x974   : > { %v1470_v43 = vpop.f32.mrb[8].mxu0 }
 0x975   : > { %v1474_v44 = vadd.f32 %v1470_v43, %v1231_v7  ;;  %v3723_v45 = vpop.f32.mrb[9].mxu0 }
 0x9d5   : > { %v1563_v46 = vpop.xlane.xlu0 %1562 }
 0x9d6   : > { %4005 = vrcp.f32 %v1563_v46 }
 0x9d9   : > { %v1567_v47 = vpop.permute.xlu0 %1566 }
 0x9da   : > { %3730 = vmatpush3.msra.mxu0 %v1567_v47 }
 0x9db   : > { %3881 = vmatprep.subr.bf16.mxu0 %v4134_v10 }
 0x9e0   : > { %v4006_v48 = vpop.eup %4005 }
 0x9e1   : > { %v1565_v49 = vmul.f32 %v4006_v48, %v4004_v41 }
 0x9e3   : > { %3732 = vmatmul.mubr.msk.f32.vlgmr.msra.gmra.mrb[10].mxu0 %vm751_vm2, %v1565_v49 }
 0x9e4   : > { %3747 = vmatprep.mubr.msk.f32.mxu0 %vm4135_vm1, %v4136_v13  ;;  %3883 = vmatpush3.bf16.msra.mxu0 %v3882_v2  ;;  %v3524_v2 = vld [vmem:[%s4792_s15] ss:$0 sm:$0xff] }
 0x9e5   : > { %3884 = vmatprep.subr.bf16.mxu0 %v4134_v10 }
 0xab6   : > { %v1638_v50 = vpop.f32.mrb[10].mxu0 }
 0xab7   : > { %v3733_v51 = vpop.f32.mrb[11].mxu0  ;;  %3737 = vmatmul.mubr.msk.f32.vlgmr.msra.gmra.mrb[12].mxu1 %vm751_vm2, %v1638_v50 }
 0xab8   : > { %3766 = vmatprep.mubr.msk.f32.mxu1 %vm4135_vm1, %v4136_v13  ;;  %3889 = vmatpush3.bf16.msra.mxu1 %v3888_v18 }
 0xab9   : > { %3890 = vmatprep.subr.bf16.mxu1 %v4134_v10 }
 0xabc   : > { %3892 = vmatpush3.bf16.msra.mxu1 %v3891_v21 }
 0xabd   : > { %3893 = vmatprep.subr.bf16.mxu1 %v4134_v10 }
 0xac0   : > { %3895 = vmatpush3.bf16.msra.mxu1 %v3894_v25 }
 0xac1   : > { %3896 = vmatprep.subr.bf16.mxu1 %v4134_v10 }
 0xac4   : > { %3898 = vmatpush3.bf16.msra.mxu1 %v3897_v29 }
 0xac5   : > { %3785 = vmatprep.subr.mxu1 %v4136_v13 }
 0xb8a   : > { %v1711_v52 = vpop.f32.mrb[12].mxu1 }
 0xb8b   : > { %v1715_v54 = vadd.f32 %v1711_v52, %v1474_v44  ;;  %v3738_v55 = vpop.f32.mrb[13].mxu1  ;;  %v3521_v44 = vld [vmem:[%s4790_s13] ss:$0 sm:$0xff] }
 0xb8c   : > { %v1968_v55 = vld [vmem:[#allocation2 + $0x28] sm:$0xff] }
 0xb8d   : > { %v1723_v56 = vadd.f32 %v3516_v53, %v1715_v54  ;;  %v1967_v54 = vld [vmem:[#allocation2 + $0x20] sm:$0xff] }
 0xb8f   : > { %v1724_v57 = vadd.f32 %v1723_v56, %v4351_v23  ;;  %v1756_v23 = vld [vmem:[%s4787_s10 + $0x10] sm:$0xff]  ;;  %v3900_v56 = vpack.c.bf16 %v1968_v55, %v1967_v54 }
 0xb90   : > { %v3885_v4 = vpack.c.bf16 %v1757_v3, %v1756_v23 }
 0xb91   : > { %v1727_v58 = vsel %vm631_vm0, %v1724_v57, 0.0 }
 0xb92   : > { %1728 = vadd.xlane.f32.xlu1 %v1727_v58  ;;  %3886 = vmatpush3.bf16.msra.mxu0 %v3885_v4  ;;  %v1970_v58 = vld [vmem:[#allocation2 + $0x38] sm:$0xff]  ;;  %v3526_v4 = vld [vmem:[%s4782_s5 + $0x1] ss:$0 sm:$0xff] }
 0xb93   : > { %3899 = vmatprep.subr.bf16.mxu0 %v4134_v10 }
 0xc1f   : > { %v1729_v59 = vpop.xlane.xlu1 %1728 }
 0xc20   : > { %v1730_v60 = vmul.f32 0.03125, %v1729_v59 }
 0xc22   : > { %v1731_v61 = vsub.f32 %v1724_v57, %v1730_v60  ;;  %v1969_v57 = vld [vmem:[#allocation2 + $0x30] sm:$0xff] }
 0xc23   : > { %v3903_v59 = vpack.c.bf16 %v1970_v58, %v1969_v57 }
 0xc24   : > { %v1732_v62 = vmul.f32 %v1731_v61, %v1731_v61 }
 0xc26   : > { %v1733_v63 = vsel %vm631_vm0, %v1732_v62, 0.0 }
 0xc27   : > { %1734 = vadd.xlane.f32.xlu1 %v1733_v63 }
 0xcb4   : > { %v1735_v5 = vpop.xlane.xlu1 %1734 }
 0xcb5   : > { %v1736_v6 = vmul.f32 0.03125, %v1735_v5 }
 0xcb7   : > { %v1737_v7 = vadd.f32 1e-12, %v1736_v6 }
 0xcb9   : > { %4007 = vrsqrt.f32 %v1737_v7 }
 0xcc3   : > { %v4008_v8 = vpop.eup %4007 }
 0xcc4   : > { %v1739_v11 = vmul.f32 %v4008_v8, %v1731_v61 }
 0xcc6   : > { %v1746_v14 = vmul.f32 %v3517_v9, %v1739_v11 }
 0xcc8   : > { %v1753_v15 = vadd.f32 %v3518_v12, %v1746_v14 }
 0xcca   : > { %3748 = vmatmul.mubr.msk.f32.vlgmr.msra.gmra.mrb[12].mxu0 %vm631_vm0, %v1753_v15 }
 0xccb   : > { %3777 = vmatprep.mubr.msk.f32.mxu0 %vm4135_vm1, %v4136_v13  ;;  %3901 = vmatpush3.bf16.msra.mxu0 %v3900_v56 }
 0xccc   : > { %3902 = vmatprep.subr.bf16.mxu0 %v4134_v10 }
 0xccf   : > { %3904 = vmatpush3.bf16.msra.mxu0 %v3903_v59 }
 0xcd0   : > { %3780 = vmatprep.subr.mxu0 %v4136_v13 }
 0xd9d   : > { %v1834_v32 = vpop.f32.mrb[12].mxu0 }
 0xd9e   : > { %v1835_v33 = vadd.f32 %v3519_v30, %v1834_v32  ;;  %v3749_v34 = vpop.f32.mrb[13].mxu0 }
 0xda0   : > { %v1839_v35 = vmul.f32 0.044715, %v1835_v33  ;;  %v1838_v41 = vmul.f32 0.5, %v1835_v33 }
 0xda2   : > { %v1840_v36 = vmul.f32 %v1839_v35, %v1835_v33 }
 0xda4   : > { %v1841_v37 = vmul.f32 %v1840_v36, %v1835_v33  ;;  %v3529_v36 = vld [vmem:[%s4783_s6 + $0x28] sm:$0xff] }
 0xda6   : > { %v1842_v38 = vadd.f32 %v1841_v37, %v1835_v33 }
 0xda8   : > { %v1843_v39 = vmul.f32 0.7978846, %v1842_v38 }
 0xdaa   : > { %4009 = vtanh.f32 %v1843_v39 }
 0xdb4   : > { %v4010_v40 = vpop.eup %4009 }
 0xdb5   : > { %v1845_v42 = vadd.f32 1.0, %v4010_v40 }
 0xdb7   : > { %v1846_v43 = vmul.f32 %v1845_v42, %v1838_v41 }
 0xdb9   : > { %3767 = vmatmul.mubr.msk.f32.vlgmr.msra.gmra.mrb[14].mxu1 %vm1862_vm3, %v1846_v43 }
 0xdba   : > { %3787 = vmatprep.mubr.msk.f32.mxu1 %vm4135_vm1, %v4136_v13 }
 0xe8c   : > { %v1932_v45 = vpop.f32.mrb[14].mxu1 }
 0xe8d   : > { %v1933_v46 = vadd.f32 %v3521_v44, %v1932_v45  ;;  %v3768_v47 = vpop.f32.mrb[15].mxu1  ;;  %v3528_v45 = vld [vmem:[%s4783_s6 + $0x20] sm:$0xff] }
 0xe8f   : > { %v1936_v48 = vadd.f32 %v1933_v46, %v1753_v15 }
 0xe91   : > { %v1939_v49 = vsel %vm631_vm0, %v1936_v48, 0.0 }
 0xe92   : > { %1940 = vadd.xlane.f32.xlu1 %v1939_v49 }
 0xf1f   : > { %v1941_v26 = vpop.xlane.xlu1 %1940 }
 0xf20   : > { %v1942_v50 = vmul.f32 0.03125, %v1941_v26 }
 0xf22   : > { %v1943_v51 = vsub.f32 %v1936_v48, %v1942_v50 }
 0xf24   : > { %v1944_v52 = vmul.f32 %v1943_v51, %v1943_v51 }
 0xf26   : > { %v1945_v53 = vsel %vm631_vm0, %v1944_v52, 0.0 }
 0xf27   : > { %1946 = vadd.xlane.f32.xlu1 %v1945_v53 }
 0xfb4   : > { %v1947_v60 = vpop.xlane.xlu1 %1946 }
 0xfb5   : > { %v1948_v61 = vmul.f32 0.03125, %v1947_v60 }
 0xfb7   : > { %v1949_v62 = vadd.f32 1e-12, %v1948_v61 }
 0xfb9   : > { %4011 = vrsqrt.f32 %v1949_v62 }
 0xfc3   : > { %v4012_v63 = vpop.eup %4011 }
 0xfc4   : > { %v1951_v1 = vmul.f32 %v4012_v63, %v1943_v51 }
 0xfc6   : > { %v1958_v23 = vmul.f32 %v3523_v0, %v1951_v1 }
 0xfc8   : > { %v4543_v3 = vadd.f32 %v3524_v2, %v1958_v23 }
 0xfca   : > { %3778 = vmatmul.mubr.msk.f32.vlgmr.msra.gmra.mrb[14].mxu0 %vm631_vm0, %v4543_v3 }
 0xfcb   : > { %3782 = vmatprep.mubr.msk.f32.mxu0 %vm4135_vm1, %v4136_v13 }
0x109d   : > { %v2048_v5 = vpop.f32.mrb[14].mxu0 }
0x109e   : > { %v4552_v6 = vadd.f32 %v3526_v4, %v2048_v5  ;;  %v3779_v7 = vpop.f32.mrb[15].mxu0 }
0x10a0   : > { %2225 = vrot.lane.b32.xlu0 %v4552_v6, %s4139_s26  ;;  %2058 = vrot.lane.b32.xlu1 %v4552_v6, %s4837_s23  ;;  %s4839_s26 = smov 56   ;;  %s4843_s23 = smov 72  }
0x10a4   : > { %2223 = vrot.lane.b32.xlu0 %v4552_v6, %s4838_s19  ;;  %s4844_s19 = smov 104  }
0x1112   : > { %v2059_v8 = vpop.permute.xlu1 %2058  ;;  %v2226_v9 = vpop.permute.xlu0 %2225 }
0x1113   : > { %3781 = vmatpush3.xpose.msk.msra.mxu0 %vm751_vm2, %v2059_v8 }
0x1114   : > { %3790 = vmatprep.subr.mxu0 %v4136_v13 }
0x1116   : > { %3783 = vmatmul.mubr.msk.f32.vlgmr.msra.gmra.mrb[16].mxu0 %vm751_vm2, %v4552_v6  ;;  %v2224_v11 = vpop.permute.xlu0 %2223 }
0x1117   : > { %3791 = vmatpush3.xpose.msk.msra.mxu0 %vm751_vm2, %v2226_v9  ;;  %3792 = vmatprep.mubr.msk.f32.mxu0 %vm4135_vm1, %v4136_v13  ;;  %v3530_v9 = vld [vmem:[%s4783_s6 + $0x30] sm:$0xff] }
0x1118   : > { %3800 = vmatprep.subr.mxu0 %v4136_v13 }
0x111a   : > { %3793 = vmatmul.mubr.msk.f32.vlgmr.msra.gmra.mrb[18].mxu0 %vm751_vm2, %v2224_v11 }
0x111b   : > { %3802 = vmatprep.mubr.msk.f32.mxu0 %vm4135_vm1, %v4136_v13  ;;  %3801 = vmatpush3.msra.mxu0 %v3529_v36  ;;  %v3549_v36 = vld [vmem:[%s4784_s7 + $0x1] ss:$0 sm:$0xff] }
0x111c   : > { %3810 = vmatprep.subr.mxu0 %v4136_v13 }
0x11e9   : > { %v2130_v12 = vpop.f32.mrb[16].mxu0 }
0x11ea   : > { %v2134_v14 = vmul.f32 0.35355338, %v2130_v12  ;;  %v3784_v15 = vpop.f32.mrb[17].mxu0 }
0x11ec   : > { %v2135_v16 = vadd.f32 %v4383_v31, %v2134_v14 }
0x11ed   : > { %v2297_v17 = vpop.f32.mrb[18].mxu0 }
0x11ee   : > { %v2301_v18 = vmul.f32 0.35355338, %v2297_v17  ;;  %v3794_v19 = vpop.f32.mrb[19].mxu0  ;;  %v2136_v20 = vsel %vm751_vm2, %v2135_v16, -inf }
0x11ef   : > { %2137 = vmax.xlane.f32.xlu0 %v2136_v20 }
0x11f0   : > { %v2302_v21 = vadd.f32 %v4383_v31, %v2301_v18 }
0x11f2   : > { %v2303_v22 = vsel %vm751_vm2, %v2302_v21, -inf }
0x11f3   : > { %2304 = vmax.xlane.f32.xlu1 %v2303_v22 }
0x1204   : > { %2314 = vrot.lane.b32.xlu1 %v4552_v6, %s4839_s26  ;;  %s4845_s26 = smov 48  }
0x1208   : > { %2538 = vrot.lane.b32.xlu1 %v4552_v6, %s4840_s21  ;;  %s3577_s21 = sshll.u32 %s4265_s0, 4 }
0x1209   : > { %s4736_s20 = scalar_lea.hbm %s4794_s17, %s3577_s21 }
0x127c   : > { %v2138_v24 = vpop.xlane.xlu0 %2137 }
0x127d   : > { %v2139_v25 = vsub.f32 %v2135_v16, %v2138_v24 }
0x127f   : > { %v2140_v27 = vmul.f32 1.442695, %v2139_v25 }
0x1280   : > { %v2305_v28 = vpop.xlane.xlu1 %2304 }
0x1281   : > { %4013 = vpow2.f32 %v2140_v27  ;;  %v2306_v29 = vsub.f32 %v2302_v21, %v2305_v28 }
0x1283   : > { %v2307_v30 = vmul.f32 1.442695, %v2306_v29 }
0x1284   : > { %v2315_v42 = vpop.permute.xlu1 %2314 }
0x1285   : > { %4015 = vpow2.f32 %v2307_v30 }
0x1288   : > { %v2539_v49 = vpop.permute.xlu1 %2538 }
0x128b   : > { %v4014_v32 = vpop.eup %4013 }
0x128c   : > { %v2142_v33 = vsel %vm751_vm2, %v4014_v32, 0.0 }
0x128d   : > { %2143 = vadd.xlane.f32.xlu0 %v2142_v33 }
0x128f   : > { %v4016_v34 = vpop.eup %4015 }
0x1290   : > { %v2309_v35 = vsel %vm751_vm2, %v4016_v34, 0.0 }
0x1291   : > { %2310 = vadd.xlane.f32.xlu0 %v2309_v35 }
0x12a7   : > { %2147 = vrot.lane.b32.xlu0 %v4552_v6, %s4841_s24 }
0x12ab   : > { %2536 = vrot.lane.b32.xlu0 %v4552_v6, %s4842_s1  ;;  %s4846_s1 = smov 40  }
0x131a   : > { %v2144_v37 = vpop.xlane.xlu0 %2143 }
0x131b   : > { %4017 = vrcp.f32 %v2144_v37 }
0x131e   : > { %v2311_v38 = vpop.xlane.xlu0 %2310 }
0x131f   : > { %4019 = vrcp.f32 %v2311_v38 }
0x1322   : > { %v2148_v39 = vpop.permute.xlu0 %2147 }
0x1323   : > { %3786 = vmatpush3.msra.mxu1 %v2148_v39 }
0x1324   : > { %3795 = vmatprep.subr.mxu1 %v4136_v13 }
0x1325   : > { %v4018_v40 = vpop.eup %4017 }
0x1326   : > { %v2146_v41 = vmul.f32 %v4018_v40, %v4014_v32  ;;  %v2537_v50 = vpop.permute.xlu0 %2536 }
0x1328   : > { %3788 = vmatmul.mubr.msk.f32.vlgmr.msra.gmra.mrb[16].mxu1 %vm751_vm2, %v2146_v41 }
0x1329   : > { %v4020_v43 = vpop.eup %4019  ;;  %3796 = vmatpush3.msra.mxu1 %v2315_v42  ;;  %3797 = vmatprep.mubr.msk.f32.mxu1 %vm4135_vm1, %v4136_v13 }
0x132a   : > { %v2313_v44 = vmul.f32 %v4020_v43, %v4016_v34  ;;  %3805 = vmatprep.subr.mxu1 %v4136_v13 }
0x132c   : > { %3798 = vmatmul.mubr.msk.f32.vlgmr.msra.gmra.mrb[18].mxu1 %vm751_vm2, %v2313_v44 }
0x132d   : > { %3807 = vmatprep.mubr.msk.f32.mxu1 %vm4135_vm1, %v4136_v13  ;;  %3806 = vmatpush3.msra.mxu1 %v3528_v45 }
0x132e   : > { %3815 = vmatprep.subr.mxu1 %v4136_v13 }
0x13fb   : > { %v2219_v46 = vpop.f32.mrb[16].mxu1 }
0x13fc   : > { %v3789_v47 = vpop.f32.mrb[17].mxu1  ;;  %3808 = vmatmul.mubr.msk.f32.vlgmr.msra.gmra.mrb[20].mxu1 %vm751_vm2, %v2219_v46 }
0x13fd   : > { %3817 = vmatprep.mubr.msk.f32.mxu1 %vm4135_vm1, %v4136_v13  ;;  %v3554_v47 = vld [vmem:[%s4787_s10 + $0x20] sm:$0xff] }
0x13ff   : > { %v2386_v48 = vpop.f32.mrb[18].mxu1 }
0x1400   : > { %v3799_v26 = vpop.f32.mrb[19].mxu1  ;;  %3803 = vmatmul.mubr.msk.f32.vlgmr.msra.gmra.mrb[20].mxu0 %vm751_vm2, %v2386_v48  ;;  %v3555_v48 = vld [vmem:[%s4787_s10 + $0x28] sm:$0xff] }
0x1401   : > { %3811 = vmatpush3.xpose.msk.msra.mxu0 %vm751_vm2, %v2539_v49  ;;  %3812 = vmatprep.mubr.msk.f32.mxu0 %vm4135_vm1, %v4136_v13  ;;  %v3906_v49 = vpack.c.bf16 %v3555_v48, %v3554_v47  ;;  %v3557_v26 = vld [vmem:[%s4787_s10 + $0x38] sm:$0xff] }
0x1402   : > { %3820 = vmatprep.subr.mxu0 %v4136_v13 }
0x1404   : > { %3813 = vmatmul.mubr.msk.f32.vlgmr.msra.gmra.mrb[22].mxu0 %vm751_vm2, %v2537_v50 }
0x1405   : > { %3822 = vmatprep.mubr.msk.f32.mxu0 %vm4135_vm1, %v4136_v13  ;;  %3821 = vmatpush3.msra.mxu0 %v3530_v9 }
0x1406   : > { %3830 = vmatprep.subr.mxu0 %v4136_v13 }
0x14cf   : > { %v2532_v51 = vpop.f32.mrb[20].mxu1 }
0x14d0   : > { %v3809_v52 = vpop.f32.mrb[21].mxu1 }
0x14d3   : > { %v2459_v53 = vpop.f32.mrb[20].mxu0 }
0x14d4   : > { %v2533_v54 = vadd.f32 %v2532_v51, %v2459_v53  ;;  %v3804_v55 = vpop.f32.mrb[21].mxu0 }
0x14d5   : > { %v3552_v55 = vld [vmem:[%s4785_s8 + $0x1] ss:$0 sm:$0xff] }
0x14d7   : > { %v2610_v56 = vpop.f32.mrb[22].mxu0 }
0x14d8   : > { %v2614_v57 = vmul.f32 0.35355338, %v2610_v56  ;;  %v3814_v58 = vpop.f32.mrb[23].mxu0 }
0x14da   : > { %v2615_v59 = vadd.f32 %v4383_v31, %v2614_v57  ;;  %v3553_v57 = vld [vmem:[%s4786_s9 + $0x1] ss:$0 sm:$0xff] }
0x14dc   : > { %v2616_v60 = vsel %vm751_vm2, %v2615_v59, -inf }
0x14dd   : > { %2617 = vmax.xlane.f32.xlu1 %v2616_v60  ;;  %v3561_v60 = vld [vmem:[%s4789_s12 + $0x40] sm:$0xff] }
0x14ee   : > { %2779 = vrot.lane.b32.xlu1 %v4552_v6, %s4843_s23 }
0x14f2   : > { %2777 = vrot.lane.b32.xlu1 %v4552_v6, %s4844_s19 }
0x156a   : > { %v2618_v61 = vpop.xlane.xlu1 %2617 }
0x156b   : > { %v2619_v62 = vsub.f32 %v2615_v59, %v2618_v61  ;;  %v3562_v61 = vld [vmem:[%s4789_s12 + $0x48] sm:$0xff] }
0x156d   : > { %v2620_v63 = vmul.f32 1.442695, %v2619_v62  ;;  %v3912_v62 = vpack.c.bf16 %v3562_v61, %v3561_v60 }
0x156e   : > { %v2780_v5 = vpop.permute.xlu1 %2779 }
0x156f   : > { %4021 = vpow2.f32 %v2620_v63  ;;  %v3563_v63 = vld [vmem:[%s4789_s12 + $0x50] sm:$0xff] }
0x1572   : > { %v2778_v8 = vpop.permute.xlu1 %2777 }
0x1579   : > { %v4022_v0 = vpop.eup %4021 }
0x157a   : > { %v2622_v1 = vsel %vm751_vm2, %v4022_v0, 0.0 }
0x157b   : > { %2623 = vadd.xlane.f32.xlu0 %v2622_v1 }
0x1591   : > { %2627 = vrot.lane.b32.xlu0 %v4552_v6, %s4845_s26  ;;  %s4814_s26 = sshll.u32 %s4329_s27, 2 }
0x1592   : > { %s622_s23 = scalar_lea.vmem %s4793_s16, %s4814_s26 }
0x1608   : > { %v2624_v2 = vpop.xlane.xlu0 %2623 }
0x1609   : > { %4023 = vrcp.f32 %v2624_v2  ;;  %v3566_v2 = vld [vmem:[%s4789_s12 + $0x68] sm:$0xff] }
0x160c   : > { %v2628_v23 = vpop.permute.xlu0 %2627 }
0x160d   : > { %3816 = vmatpush3.msra.mxu1 %v2628_v23 }
0x160e   : > { %3825 = vmatprep.subr.mxu1 %v4136_v13 }
0x1613   : > { %v4024_v4 = vpop.eup %4023 }
0x1614   : > { %v2626_v7 = vmul.f32 %v4024_v4, %v4022_v0  ;;  %v3564_v0 = vld [vmem:[%s4789_s12 + $0x58] sm:$0xff]  ;;  %v3567_v4 = vld [vmem:[%s4789_s12 + $0x70] sm:$0xff] }
0x1615   : > { %v3915_v1 = vpack.c.bf16 %v3564_v0, %v3563_v63 }
0x1616   : > { %3818 = vmatmul.mubr.msk.f32.vlgmr.msra.gmra.mrb[22].mxu1 %vm751_vm2, %v2626_v7 }
0x1617   : > { %3826 = vmatpush3.xpose.msk.msra.mxu1 %vm751_vm2, %v2780_v5  ;;  %3827 = vmatprep.mubr.msk.f32.mxu1 %vm4135_vm1, %v4136_v13  ;;  %v3568_v5 = vld [vmem:[%s4789_s12 + $0x78] sm:$0xff] }
0x1618   : > { %3835 = vmatprep.subr.mxu1 %v4136_v13  ;;  %v3921_v7 = vpack.c.bf16 %v3568_v5, %v3567_v4 }
0x161a   : > { %3828 = vmatmul.mubr.msk.f32.vlgmr.msra.gmra.mrb[24].mxu1 %vm751_vm2, %v2778_v8  ;;  %v3559_v8 = vld [vmem:[%s4788_s11 + $0x1] ss:$0 sm:$0xff] }
0x161b   : > { %3837 = vmatprep.mubr.msk.f32.mxu1 %vm4135_vm1, %v4136_v13 }
0x16e9   : > { %v2699_v11 = vpop.f32.mrb[22].mxu1 }
0x16ea   : > { %v3819_v12 = vpop.f32.mrb[23].mxu1  ;;  %3823 = vmatmul.mubr.msk.f32.vlgmr.msra.gmra.mrb[24].mxu0 %vm751_vm2, %v2699_v11 }
0x16eb   : > { %3832 = vmatprep.mubr.msk.f32.mxu0 %vm4135_vm1, %v4136_v13 }
0x16ed   : > { %v2851_v14 = vpop.f32.mrb[24].mxu1 }
0x16ee   : > { %v2855_v15 = vmul.f32 0.35355338, %v2851_v14  ;;  %v3829_v16 = vpop.f32.mrb[25].mxu1 }
0x16f0   : > { %v2856_v17 = vadd.f32 %v4383_v31, %v2855_v15 }
0x16f2   : > { %v2857_v18 = vsel %vm751_vm2, %v2856_v17, -inf }
0x16f3   : > { %2858 = vmax.xlane.f32.xlu0 %v2857_v18 }
0x1709   : > { %2868 = vrot.lane.b32.xlu0 %v4552_v6, %s4846_s1  ;;  %v3531_v6 = vld [vmem:[%s4783_s6 + $0x38] sm:$0xff]  ;;  %s604_s1 = sand.u32 1, %s4121_s28  }
0x170a   : > { %3836 = vmatpush3.msra.mxu1 %v3531_v6  ;;  %s605_s19 = scalar_lea.vmem [#allocation5], %s604_s1  ;;  %s3355_s22 = scalar_lea.sflag [#allocation4], %s604_s1 }
0x170b   : > { %3911 = vmatprep.subr.bf16.mxu1 %v4134_v10  ;;  %s3371_s24 = sshll.u32 %s605_s19, 4  ;;  %s3372_s24 = int_to_ptr.vmem [resolvable:$true] %s3371_s24 }
0x170c   : > { %s4063_s25 = scalar_lea.vmem %s3372_s24, 16 }
0x170d   : > { %p4064_p6 = scmp.ne.s32.totalorder %s3372_s24, %s4063_s25 }
0x170f   : > { %p4065_p10 = pnand %p4064_p6, %p4847_p9 }
0x1711   : > { %p4066_p12 = pneg %p4065_p10 }
0x1780   : > { %v2859_v19 = vpop.xlane.xlu0 %2858 }
0x1781   : > { %v2860_v20 = vsub.f32 %v2856_v17, %v2859_v19 }
0x1783   : > { %v2861_v21 = vmul.f32 1.442695, %v2860_v20 }
0x1784   : > { %v2869_v22 = vpop.permute.xlu0 %2868 }
0x1785   : > { %4025 = vpow2.f32 %v2861_v21  ;;  %3831 = vmatpush3.msra.mxu0 %v2869_v22 }
0x1786   : > { %3905 = vmatprep.subr.bf16.mxu0 %v4134_v10 }
0x178f   : > { %v4026_v24 = vpop.eup %4025 }
0x1790   : > { %v2863_v25 = vsel %vm751_vm2, %v4026_v24, 0.0 }
0x1791   : > { %2864 = vadd.xlane.f32.xlu1 %v2863_v25 }
0x17bd   : > { %v2772_v27 = vpop.f32.mrb[24].mxu0 }
0x17be   : > { %v2776_v31 = vadd.f32 %v2772_v27, %v2533_v54  ;;  %v3824_v28 = vpop.f32.mrb[25].mxu0 }
0x181e   : > { %v2865_v29 = vpop.xlane.xlu1 %2864 }
0x181f   : > { %4027 = vrcp.f32 %v2865_v29 }
0x1829   : > { %v4028_v30 = vpop.eup %4027 }
0x182a   : > { %v2867_v32 = vmul.f32 %v4028_v30, %v4026_v24 }
0x182c   : > { %3833 = vmatmul.mubr.msk.f32.vlgmr.msra.gmra.mrb[26].mxu0 %vm751_vm2, %v2867_v32 }
0x182d   : > { %3848 = vmatprep.mubr.msk.f32.mxu0 %vm4135_vm1, %v4136_v13  ;;  %3907 = vmatpush3.bf16.msra.mxu0 %v3906_v49 }
0x182e   : > { %3908 = vmatprep.subr.bf16.mxu0 %v4134_v10 }
0x18ff   : > { %v2940_v33 = vpop.f32.mrb[26].mxu0 }
0x1900   : > { %v3834_v34 = vpop.f32.mrb[27].mxu0  ;;  %3838 = vmatmul.mubr.msk.f32.vlgmr.msra.gmra.mrb[26].mxu1 %vm751_vm2, %v2940_v33 }
0x1901   : > { %3867 = vmatprep.mubr.msk.f32.mxu1 %vm4135_vm1, %v4136_v13  ;;  %3913 = vmatpush3.bf16.msra.mxu1 %v3912_v62 }
0x1902   : > { %3914 = vmatprep.subr.bf16.mxu1 %v4134_v10 }
0x1905   : > { %3916 = vmatpush3.bf16.msra.mxu1 %v3915_v1 }
0x1906   : > { %3917 = vmatprep.subr.bf16.mxu1 %v4134_v10 }
0x19d3   : > { %v3013_v35 = vpop.f32.mrb[26].mxu1 }
0x19d4   : > { %v3017_v37 = vadd.f32 %v3013_v35, %v2776_v31  ;;  %v3839_v38 = vpop.f32.mrb[27].mxu1 }
0x19d5   : > { %v3574_v38 = vld [vmem:[%s4791_s14 + $0x1] ss:$0 sm:$0xff] }
0x19d6   : > { %v3026_v39 = vadd.f32 %v3549_v36, %v3017_v37 }
0x19d8   : > { %v3027_v40 = vadd.f32 %v3026_v39, %v4543_v3  ;;  %v3556_v3 = vld [vmem:[%s4787_s10 + $0x30] sm:$0xff] }
0x19d9   : > { %v3909_v50 = vpack.c.bf16 %v3557_v26, %v3556_v3 }
0x19da   : > { %v3032_v41 = vsel %vm631_vm0, %v3027_v40, 0.0 }
0x19db   : > { %3033 = vadd.xlane.f32.xlu1 %v3032_v41  ;;  %3910 = vmatpush3.bf16.msra.mxu0 %v3909_v50 }
0x19dc   : > { %3870 = vmatprep.subr.mxu0 %v4136_v13 }
0x1a68   : > { %v3034_v42 = vpop.xlane.xlu1 %3033 }
0x1a69   : > { %v3035_v43 = vmul.f32 0.03125, %v3034_v42 }
0x1a6b   : > { %v3036_v44 = vsub.f32 %v3027_v40, %v3035_v43  ;;  %v3575_v40 = vld [vmem:[%s4792_s15 + $0x1] ss:$0 sm:$0xff] }
0x1a6c   : > { %v3278_v43 = vld [vmem:[%s622_s23] sm:$0x7]  ;;  %s4148_s23 = smov [#allocation5]  }
0x1a6d   : > { %v3037_v45 = vmul.f32 %v3036_v44, %v3036_v44  ;;  %s4067_s26 = sshll.u32 %s4148_s23, 4  ;;  %s4068_s26 = int_to_ptr.vmem [resolvable:$false] %s4067_s26 }
0x1a6e   : > { %s4069_s4 = scalar_lea.vmem %s4068_s26, 32  ;;  %p4070_p2 = scmp.lt.s32.totalorder %s3372_s24, %s4068_s26 }
0x1a6f   : > { %v3038_v46 = vsel %vm631_vm0, %v3037_v45, 0.0  ;;  %p4071_p3 = scmp.lt.s32.totalorder %s4069_s4, %s4063_s25 }
0x1a70   : > { %3039 = vadd.xlane.f32.xlu1 %v3038_v46 }
0x1a71   : > { %p4072_p4 = por %p4071_p3, %p4070_p2 }
0x1a73   : > { %p4073_p7 = pnand %p4072_p4, %p4066_p12 }
0x1afd   : > { %v3040_v51 = vpop.xlane.xlu1 %3039 }
0x1afe   : > { %v3041_v52 = vmul.f32 0.03125, %v3040_v51 }
0x1b00   : > { %v3042_v53 = vadd.f32 1e-12, %v3041_v52 }
0x1b02   : > { %4029 = vrsqrt.f32 %v3042_v53 }
0x1b0c   : > { %v4030_v54 = vpop.eup %4029 }
0x1b0d   : > { %v3044_v56 = vmul.f32 %v4030_v54, %v3036_v44 }
0x1b0f   : > { %v3051_v58 = vmul.f32 %v3552_v55, %v3044_v56 }
0x1b11   : > { %v3058_v59 = vadd.f32 %v3553_v57, %v3051_v58 }
0x1b13   : > { %3849 = vmatmul.mubr.msk.f32.vlgmr.msra.gmra.mrb[28].mxu0 %vm631_vm0, %v3058_v59 }
0x1b14   : > { %3872 = vmatprep.mubr.msk.f32.mxu0 %vm4135_vm1, %v4136_v13  ;;  %v3565_v13 = vld [vmem:[%s4789_s12 + $0x60] sm:$0xff] }
0x1b15   : > { %v3918_v23 = vpack.c.bf16 %v3566_v2, %v3565_v13 }
0x1b17   : > { %3919 = vmatpush3.bf16.msra.mxu1 %v3918_v23 }
0x1b18   : > { %3920 = vmatprep.subr.bf16.mxu1 %v4134_v10  ;;  %v3570_v10 = vld [vmem:[%s4790_s13 + $0x1] ss:$0 sm:$0xff] }
0x1b1b   : > { %3922 = vmatpush3.bf16.msra.mxu1 %v3921_v7 }
0x1be6   : > { %v3141_v9 = vpop.f32.mrb[28].mxu0 }
0x1be7   : > { %v3142_v11 = vadd.f32 %v3559_v8, %v3141_v9  ;;  %v3850_v12 = vpop.f32.mrb[29].mxu0 }
0x1be9   : > { %v3146_v14 = vmul.f32 0.044715, %v3142_v11  ;;  %v3145_v20 = vmul.f32 0.5, %v3142_v11 }
0x1beb   : > { %v3147_v15 = vmul.f32 %v3146_v14, %v3142_v11 }
0x1bed   : > { %v3148_v16 = vmul.f32 %v3147_v15, %v3142_v11 }
0x1bef   : > { %v3149_v17 = vadd.f32 %v3148_v16, %v3142_v11 }
0x1bf1   : > { %v3150_v18 = vmul.f32 0.7978846, %v3149_v17 }
0x1bf3   : > { %4031 = vtanh.f32 %v3150_v18 }
0x1bfd   : > { %v4032_v19 = vpop.eup %4031 }
0x1bfe   : > { %v3152_v21 = vadd.f32 1.0, %v4032_v19 }
0x1c00   : > { %v3153_v22 = vmul.f32 %v3152_v21, %v3145_v20 }
0x1c02   : > { %3868 = vmatmul.mubr.msk.f32.vlgmr.msra.gmra.mrb[28].mxu1 %vm1862_vm3, %v3153_v22 }
0x1cd5   : > { %v3240_v24 = vpop.f32.mrb[28].mxu1 }
0x1cd6   : > { %v3241_v25 = vadd.f32 %v3570_v10, %v3240_v24  ;;  %v3869_v27 = vpop.f32.mrb[29].mxu1 }
0x1cd8   : > { %v3244_v31 = vadd.f32 %v3241_v25, %v3058_v59 }
0x1cda   : > { %v3249_v28 = vsel %vm631_vm0, %v3244_v31, 0.0 }
0x1cdb   : > { %3250 = vadd.xlane.f32.xlu1 %v3249_v28 }
0x1d68   : > { %v3251_v29 = vpop.xlane.xlu1 %3250 }
0x1d69   : > { %v3252_v30 = vmul.f32 0.03125, %v3251_v29 }
0x1d6b   : > { %v3253_v32 = vsub.f32 %v3244_v31, %v3252_v30 }
0x1d6d   : > { %v3254_v6 = vmul.f32 %v3253_v32, %v3253_v32 }
0x1d6f   : > { %v3255_v33 = vsel %vm631_vm0, %v3254_v6, 0.0 }
0x1d70   : > { %3256 = vadd.xlane.f32.xlu1 %v3255_v33 }
0x1dfd   : > { %v3257_v34 = vpop.xlane.xlu1 %3256 }
0x1dfe   : > { %v3258_v35 = vmul.f32 0.03125, %v3257_v34 }
0x1e00   : > { %v3259_v36 = vadd.f32 1e-12, %v3258_v35 }
0x1e02   : > { %4033 = vrsqrt.f32 %v3259_v36 }
0x1e0c   : > { %v4034_v37 = vpop.eup %4033 }
0x1e0d   : > { %v3261_v39 = vmul.f32 %v4034_v37, %v3253_v32 }
0x1e0f   : > { %v3268_v41 = vmul.f32 %v3574_v38, %v3261_v39 }
0x1e11   : > { %v3275_v42 = vadd.f32 %v3575_v40, %v3268_v41 }
0x1e13   : > { %3871 = vmatpush3.msra.mxu0 %v3275_v42  ;;  %3277 = vst.msk [vmem:[%s605_s19] sm:$0x1] %vm3276_vm4, %v3275_v42 }
0x1e14   : > { %3873 = vmatmul.mubr.msk.f32.vlgmr.msra.gmra.mrb[30].mxu0 %vm751_vm2, %v3278_v43 }
0x1e15   : > { %4076 = shalt.err (!%p4073_p7)
}
0x1e16   : > { %s4077_s3 = scalar_lea.hbm %s4736_s20, 16  ;;  %s4081_s19 = scalar_lea.hbm %s4794_s17, 32 }
0x1e17   : > { %p4078_p8 = scmp.ne.s32.totalorder %s4736_s20, %s4077_s3  ;;  %p4082_p1 = scmp.lt.u32.totalorder %s4736_s20, %s4794_s17 }
0x1e18   : > { %p4083_p0 = scmp.lt.u32.totalorder %s4081_s19, %s4077_s3  ;;  %p4085_p6 = scmp.lt.u32.totalorder %s4077_s3, %s4736_s20 }
0x1e19   : > { %p4079_p11 = pnand %p4078_p8, %p4847_p9 }
0x1e1a   : > { %p4084_p5 = por %p4083_p0, %p4082_p1 }
0x1e1b   : > { %p4080_p13 = pneg %p4079_p11 }
0x1e1c   : > { %p4086_p10 = por %p4085_p6, %p4084_p5 }
0x1e1e   : > { %p4087_p12 = pnand %p4086_p10, %p4080_p13 }
0x1e20   : > { %4090 = shalt.err (!%p4087_p12)
}
0x1e21   : > { %3927 = dma.vmem_to_hbm [thread:$0]  (%p4847_p9), %s3372_s24, 16, %s4736_s20, %s3355_s22   ;;  %vm3352_vm5 = vcmask 256000  }
0x1e22   : > { %s4848_s4 = sshll.u32 %s4329_s27, 2 }
0x1e23   : > { %s626_s23 = scalar_lea.vmem %s4795_s18, %s4848_s4 }
0x1ee7   : > { %v3348_v44 = vpop.f32.mrb[30].mxu0 }
0x1ee8   : > { %3353 = vst.msk [vmem:[%s626_s23] sm:$0x7] %vm3352_vm5, %v3348_v44  ;;  %v3874_v45 = vpop.f32.mrb[31].mxu0 }
0x1ee9 PF: > { %s4849_s3 = sld [smem:[#allocation8_spill]]  ;;  %s4850_s0 = sld [smem:[#allocation12_spill]] }
0x1eea   : > { %p3939_p2 = scmp.ge.s32.totalorder %s4129_s30, 2 }
0x1eef   : > { %s3386_s1 = sand.u32 1, %s4849_s3   ;;  %p4851_p3 = scmp.ne.s32.totalorder %s4850_s0, 0 }
0x1ef0   : > { %s3387_s2 = scalar_lea.sflag [#allocation4], %s3386_s1 }
0x1ef1   : > { %p3934_p4 = pnand %p3939_p2, %p4851_p3 }
0x1ef3   : > { %4112 = dma.done.wait (!%p3934_p4), %s3387_s2, 16  }
0x1ef4   : > { %4114 = vsyncadd (!%p3934_p4), %s3387_s2, 4294967280  ;;  %s4852_s30 = sld [smem:[#allocation10_spill]]  ;;  %s4853_s24 = sld [smem:[#allocation9_spill]] }
0x1ef5   : > { %s4854_s29 = sld [smem:[#allocation11_spill]]  ;;  %s4855_s27 = smov %s4121_s28 }
0x1efa   : > { %p30_p9 = scmp.ge.s32.totalorder %s4852_s30, 4   ;;  %s4856_s28 = smov %s4853_s24 }
0x1efc   :  { %32 = sbr.rel (!%p30_p9) target bundleno = 10 (0xa), region = 158 }
0x1f03   :  { %3398 = vsyncpa [#allocation3], 1 }
0x1f04   :  { %3400 = vsyncpa [#allocation3 + $0x1], 1 }
0x1f05   :  { %3401 = vsyncpa [#allocation4], 1 }
0x1f06   :  { %3403 = vsyncpa [#allocation4 + $0x1], 1 }

</bundles_post_ra>
